<compile_context>
chip_gen: v6e
topology: v6e:2x2x1
jax: 0.10.0
libtpu: 0.0.40
codegen_flags: <defaults>
</compile_context>

<pallas_src>
import math

import numpy as np
import jax
import jax.numpy as jnp
from jax import lax
from jax.experimental import pallas as pl
from jax.experimental.pallas import tpu as pltpu

# ----------------------------- model config ---------------------------------
VOCAB = 16          # input_size
D_MODEL = 32        # d_model
N_LAYERS = 2
N_HEAD = 8          # nn.TransformerEncoderLayer(nhead=8)
HEAD_DIM = D_MODEL // N_HEAD
D_FF = 2048         # PyTorch default dim_feedforward
PAD_INDEX = 1
MAX_LEN = 20        # PositionalEncoding max_len
LN_EPS = 1e-5
NEG_INF = -1e30     # finite stand-in for -inf (avoids 0/0 NaN on all-pad rows)

B = 2               # batch
S = 8               # sequence length
T = B * S           # flattened tokens
HT = N_HEAD * T     # stacked-head rows (= 128, fills the MXU row dim)


# ----------------------------- fused Pallas kernel ---------------------------
def _layer_norm(x, g, b):
    mu = jnp.mean(x, axis=-1, keepdims=True)
    ms = jnp.mean(x * x, axis=-1, keepdims=True)
    var = jnp.maximum(ms - mu * mu, 0.0)
    return (x - mu) * lax.rsqrt(var + LN_EPS) * g + b


def fused_encoder_kernel(
        # layer-invariant operands (resident in VMEM, fetched once)
        tok_col_ref, tok_row_ref, bias_base_ref, emb_ref, pe_ref,
        hmbig_ref, rep_ref,
        # per-layer operands (blocked on the leading layer axis -> pipelined)
        wq_ref, wk_ref, wv_ref, bq_ref, bk_ref, bv_ref, wo_ref, bo_ref,
        g1_ref, be1_ref, w1_ref, b1_ref, w2_ref, b2_ref, g2_ref, be2_ref,
        # output + activation carry
        out_ref, x_ref):
    """One encoder layer per grid step; embedding+PE done at step 0.

    Activations are flattened to [T, D] with T = B*S; per-sequence attention
    is enforced with a block-diagonal additive bias.  All heads are processed
    with one stacked [HT, *] matmul chain instead of a per-head loop.
    """
    l = pl.program_id(0)

    # ---- step 0: embedding gather (one-hot matmul) + positional encoding ----
    @pl.when(l == 0)
    def _():
        tok_col = tok_col_ref[...]                               # [T, 1] int32
        onehot = (tok_col == lax.broadcasted_iota(jnp.int32, (T, VOCAB), 1)
                  ).astype(jnp.float32)
        # pad row of emb is zero -> padding_idx semantics; dropout = identity
        x_ref[...] = jnp.dot(onehot, emb_ref[...],
                             preferred_element_type=jnp.float32) + pe_ref[...]

    x = x_ref[...]                                               # [T, D]

    # additive attention bias: block-diagonal (batch) + key padding, stacked
    # over heads -> [HT, T]
    bias = jnp.where(tok_row_ref[...] == PAD_INDEX, NEG_INF, bias_base_ref[...])

    hmbig = hmbig_ref[...]                                       # [HT, D]
    rep = rep_ref[...]                                           # [HT, T]

    # ---- self-attention (1/sqrt(head_dim) folded into wq/bq offline) ----
    q = jnp.dot(x, wq_ref[0], preferred_element_type=jnp.float32) + bq_ref[0]
    k = jnp.dot(x, wk_ref[0], preferred_element_type=jnp.float32) + bk_ref[0]
    v = jnp.dot(x, wv_ref[0], preferred_element_type=jnp.float32) + bv_ref[0]

    # stacked-head q: row h*T+t holds q[t] masked to head h's dims
    qs = jnp.dot(rep, q, preferred_element_type=jnp.float32) * hmbig   # [HT, D]
    # scores for all heads in one matmul: [HT, T]
    s = lax.dot_general(qs, k, (((1,), (1,)), ((), ())),
                        preferred_element_type=jnp.float32) + bias
    m = jnp.max(s, axis=-1, keepdims=True)
    p = jnp.exp(s - m)
    p = p / jnp.sum(p, axis=-1, keepdims=True)                   # ONE softmax
    # per-head outputs land only in that head's columns; summing over heads
    # (one [T,HT]x[HT,D] matmul via rep^T) reconstructs the concat.
    o = jnp.dot(p, v, preferred_element_type=jnp.float32) * hmbig       # [HT, D]
    attn = lax.dot_general(rep, o, (((0,), (0,)), ((), ())),
                           preferred_element_type=jnp.float32)          # [T, D]
    attn = jnp.dot(attn, wo_ref[0], preferred_element_type=jnp.float32) + bo_ref[0]

    # ---- residual + LayerNorm 1 (post-norm) ----
    x1 = _layer_norm(x + attn, g1_ref[0], be1_ref[0])

    # ---- feed-forward (bf16 weights, upcast in-kernel, f32 accumulation) ----
    w1 = w1_ref[0].astype(jnp.float32)                           # [D, D_FF]
    w2 = w2_ref[0].astype(jnp.float32)                           # [D, D_FF] lane-dense
    hid = jnp.maximum(
        jnp.dot(x1, w1, preferred_element_type=jnp.float32) + b1_ref[0], 0.0)
    ff = lax.dot_general(hid, w2, (((1,), (1,)), ((), ())),
                         preferred_element_type=jnp.float32) + b2_ref[0]

    # ---- residual + LayerNorm 2 ----
    x2 = _layer_norm(x1 + ff, g2_ref[0], be2_ref[0])

    x_ref[...] = x2          # carry to next layer
    out_ref[...] = x2        # resident output block; flushed after last step


# ----------------------------- wrapper ---------------------------------------
def transformer_encoder_forward(tokens, params):
    """Equivalent of the module forward: returns (output [B,S,D], pad_mask)."""
    Bsz, Ss = tokens.shape
    kp = params["kernel"]
    tok_col = tokens.reshape(T, 1).astype(jnp.int32)
    tok_row = tokens.reshape(1, T).astype(jnp.int32)

    invariant = (tok_col, tok_row, kp["bias_base"], kp["emb"], kp["pe"],
                 kp["hmbig"], kp["rep"])
    per_layer = (kp["wq"], kp["wk"], kp["wv"], kp["bq"], kp["bk"], kp["bv"],
                 kp["wo"], kp["bo"], kp["g1"], kp["be1"],
                 kp["w1"], kp["b1"], kp["w2"], kp["b2"], kp["g2"], kp["be2"])

    def full_spec(arr):
        # whole array resident across the layer axis (fetched once)
        return pl.BlockSpec(arr.shape, lambda l, _nd=arr.ndim: (0,) * _nd)

    def layer_spec(arr):
        # blocked on the leading layer axis -> pipelined weight DMA
        nd = arr.ndim
        return pl.BlockSpec((1,) + tuple(arr.shape[1:]),
                            lambda l, _nd=nd: (l,) + (0,) * (_nd - 1))

    in_specs = ([full_spec(a) for a in invariant]
                + [layer_spec(a) for a in per_layer])

    out_flat = pl.pallas_call(
        fused_encoder_kernel,
        out_shape=jax.ShapeDtypeStruct((T, D_MODEL), jnp.float32),
        grid_spec=pltpu.PrefetchScalarGridSpec(
            num_scalar_prefetch=0,
            grid=(N_LAYERS,),
            in_specs=in_specs,
            out_specs=pl.BlockSpec((T, D_MODEL), lambda l: (0, 0)),
            scratch_shapes=[pltpu.VMEM((T, D_MODEL), jnp.float32)]),
        compiler_params=pltpu.CompilerParams(
            dimension_semantics=("arbitrary",)),
    )(*invariant, *per_layer)

    pad_mask = (tokens == PAD_INDEX)
    return out_flat.reshape(Bsz, Ss, D_MODEL), pad_mask


# ----------------------------- pure-JAX reference ----------------------------
def _layer_norm_ref(x, g, b):
    mu = jnp.mean(x, axis=-1, keepdims=True)
    var = jnp.mean((x - mu) ** 2, axis=-1, keepdims=True)
    return (x - mu) * lax.rsqrt(var + LN_EPS) * g + b


def reference_forward(tokens, params):
    seq = tokens.shape[1]
    x = jnp.take(params["embedding"], tokens, axis=0).astype(jnp.float32)
    x = x + params["pe"][None, :seq, :]
    keypad = (tokens == PAD_INDEX)
    for lp in params["layers"]:
        Bs, Ss, D = x.shape
        q = (x @ lp["wqT"] + lp["bq"]).reshape(Bs, Ss, N_HEAD, HEAD_DIM)
        k = (x @ lp["wkT"] + lp["bk"]).reshape(Bs, Ss, N_HEAD, HEAD_DIM)
        v = (x @ lp["wvT"] + lp["bv"]).reshape(Bs, Ss, N_HEAD, HEAD_DIM)
        s = jnp.einsum("bqhd,bkhd->bhqk", q, k) / math.sqrt(HEAD_DIM)
        s = jnp.where(keypad[:, None, None, :], -jnp.inf, s)
        p = jax.nn.softmax(s, axis=-1)
        o = jnp.einsum("bhqk,bkhd->bqhd", p, v).reshape(Bs, Ss, D)
        o = o @ lp["woT"] + lp["bo"]
        x1 = _layer_norm_ref(x + o, lp["g1"], lp["be1"])
        ff = jnp.maximum(x1 @ lp["w1T"] + lp["b1"], 0.0) @ lp["w2T"] + lp["b2"]
        x = _layer_norm_ref(x1 + ff, lp["g2"], lp["be2"])
    return x, keypad


# ----------------------------- parameter init --------------------------------
def init_params(key):
    keys = iter(jax.random.split(key, 8 + 16 * N_LAYERS))

    emb = jax.random.normal(next(keys), (VOCAB, D_MODEL), jnp.float32)
    emb = emb.at[PAD_INDEX].set(0.0)   # padding_idx row zeroed (PyTorch semantics)

    # sinusoidal positional encoding, exactly as in PositionalEncoding.__init__
    position_enc = np.array(
        [[pos / np.power(10000, 2 * (j // 2) / D_MODEL) for j in range(D_MODEL)]
         for pos in range(MAX_LEN)])
    pe = np.zeros((MAX_LEN, D_MODEL), np.float32)
    pe[:, 0::2] = np.sin(position_enc[:, 0::2])
    pe[:, 1::2] = np.cos(position_enc[:, 1::2])
    pe = jnp.asarray(pe)

    def bf16_round(a):
        # round-trip so kernel (bf16) and reference (f32) use identical values
        return a.astype(jnp.bfloat16).astype(jnp.float32)

    layers = []
    for _ in range(N_LAYERS):
        in_proj_w = jax.random.normal(next(keys), (3 * D_MODEL, D_MODEL)) * 0.1
        in_proj_b = jax.random.normal(next(keys), (3 * D_MODEL,)) * 0.02
        wq, wk, wv = jnp.split(in_proj_w, 3, axis=0)
        bq, bk, bv = jnp.split(in_proj_b, 3, axis=0)
        wo = jax.random.normal(next(keys), (D_MODEL, D_MODEL)) * 0.1
        bo = jax.random.normal(next(keys), (D_MODEL,)) * 0.02
        w1 = jax.random.normal(next(keys), (D_FF, D_MODEL)) * 0.05
        b1 = jax.random.normal(next(keys), (D_FF,)) * 0.02
        w2 = jax.random.normal(next(keys), (D_MODEL, D_FF)) * 0.05
        b2 = jax.random.normal(next(keys), (D_MODEL,)) * 0.02
        w1T = bf16_round(w1.T)     # [D, D_FF]  lane-dense
        w2_ld = bf16_round(w2)     # [D, D_FF]  lane-dense (kernel layout)
        layers.append(dict(
            wqT=wq.T, wkT=wk.T, wvT=wv.T,                 # pre-transposed for x @ W^T
            bq=bq.reshape(1, -1), bk=bk.reshape(1, -1), bv=bv.reshape(1, -1),
            woT=wo.T, bo=bo.reshape(1, -1),
            g1=jnp.ones((1, D_MODEL), jnp.float32),
            be1=jnp.zeros((1, D_MODEL), jnp.float32),
            w1T=w1T, b1=b1.reshape(1, -1),
            w2T=w2_ld.T, w2_ld=w2_ld, b2=b2.reshape(1, -1),
            g2=jnp.ones((1, D_MODEL), jnp.float32),
            be2=jnp.zeros((1, D_MODEL), jnp.float32),
        ))

    # ---- kernel-side constant prep (offline) ----
    scale = 1.0 / math.sqrt(HEAD_DIM)

    def stack(name, f=lambda a: a):
        return jnp.stack([f(lp[name]) for lp in layers])

    # [HT, D] head masks (row h*T+t -> ones on head-h dims)
    hmbig = np.zeros((HT, D_MODEL), np.float32)
    for h in range(N_HEAD):
        hmbig[h * T:(h + 1) * T, h * HEAD_DIM:(h + 1) * HEAD_DIM] = 1.0

    # block-diagonal (per-sequence) additive bias, tiled over heads -> [HT, T]
    blockmask = np.full((T, T), NEG_INF, np.float32)
    for b in range(B):
        blockmask[b * S:(b + 1) * S, b * S:(b + 1) * S] = 0.0
    bias_base = np.tile(blockmask, (N_HEAD, 1))

    # replication matrix: rep[h*T+t, t] = 1 (also used transposed for head-sum)
    rep = np.tile(np.eye(T, dtype=np.float32), (N_HEAD, 1))

    kernel_params = dict(
        emb=emb,
        pe=jnp.tile(pe[:S], (B, 1)),                  # [T, D], constant
        hmbig=jnp.asarray(hmbig),                     # [HT, D]
        bias_base=jnp.asarray(bias_base),             # [HT, T]
        rep=jnp.asarray(rep),                         # [HT, T]
        wq=stack("wqT", lambda a: a * scale), wk=stack("wkT"), wv=stack("wvT"),
        bq=stack("bq", lambda a: a * scale), bk=stack("bk"), bv=stack("bv"),
        wo=stack("woT"), bo=stack("bo"),
        g1=stack("g1"), be1=stack("be1"),
        w1=stack("w1T").astype(jnp.bfloat16), b1=stack("b1"),
        w2=stack("w2_ld").astype(jnp.bfloat16), b2=stack("b2"),
        g2=stack("g2"), be2=stack("be2"),
    )
    return dict(embedding=emb, pe=pe, layers=layers, kernel=kernel_params)


# ----------------------------- main ------------------------------------------
if __name__ == "__main__":
    key = jax.random.PRNGKey(0)
    pkey, tkey = jax.random.split(key)
    params = init_params(pkey)

    tokens = jax.random.randint(tkey, (B, S), 0, VOCAB, dtype=jnp.int32)
    # make sure the pad mask is exercised
    tokens = tokens.at[0, S - 2:].set(PAD_INDEX)
    tokens = tokens.at[0, 0].set(3)   # guarantee a non-pad token in row 0

    out, pad_mask = transformer_encoder_forward(tokens, params)
    out = jax.block_until_ready(out)
    pad_mask = jax.block_until_ready(pad_mask)

    ref_out, ref_mask = reference_forward(tokens, params)
    assert out.shape == (B, S, D_MODEL) and pad_mask.shape == (B, S)
    assert bool(jnp.all(pad_mask == ref_mask))
    assert bool(jnp.allclose(out, ref_out, atol=1e-3, rtol=1e-3))

    print("KERNEL_OK")
</pallas_src>

<mosaic_0001>
module attributes {stable_mosaic.version = 11 : i64} {
  func.func @fused_encoder_kernel(%arg0: i32, %arg1: memref<16x1xi32, #tpu.memory_space<vmem>>, %arg2: memref<1x16xi32, #tpu.memory_space<vmem>>, %arg3: memref<128x16xf32, #tpu.memory_space<vmem>>, %arg4: memref<16x32xf32, #tpu.memory_space<vmem>>, %arg5: memref<16x32xf32, #tpu.memory_space<vmem>>, %arg6: memref<128x32xf32, #tpu.memory_space<vmem>>, %arg7: memref<128x16xf32, #tpu.memory_space<vmem>>, %arg8: memref<1x32x32xf32, #tpu.memory_space<vmem>>, %arg9: memref<1x32x32xf32, #tpu.memory_space<vmem>>, %arg10: memref<1x32x32xf32, #tpu.memory_space<vmem>>, %arg11: memref<1x1x32xf32, #tpu.memory_space<vmem>>, %arg12: memref<1x1x32xf32, #tpu.memory_space<vmem>>, %arg13: memref<1x1x32xf32, #tpu.memory_space<vmem>>, %arg14: memref<1x32x32xf32, #tpu.memory_space<vmem>>, %arg15: memref<1x1x32xf32, #tpu.memory_space<vmem>>, %arg16: memref<1x1x32xf32, #tpu.memory_space<vmem>>, %arg17: memref<1x1x32xf32, #tpu.memory_space<vmem>>, %arg18: memref<1x32x2048xbf16, #tpu.memory_space<vmem>>, %arg19: memref<1x1x2048xf32, #tpu.memory_space<vmem>>, %arg20: memref<1x32x2048xbf16, #tpu.memory_space<vmem>>, %arg21: memref<1x1x32xf32, #tpu.memory_space<vmem>>, %arg22: memref<1x1x32xf32, #tpu.memory_space<vmem>>, %arg23: memref<1x1x32xf32, #tpu.memory_space<vmem>>, %arg24: memref<16x32xf32, #tpu.memory_space<vmem>>, %arg25: memref<16x32xf32, #tpu.memory_space<vmem>>) attributes {dimension_semantics = [#tpu.dimension_semantics<arbitrary>], iteration_bounds = array<i64: 2>, scalar_prefetch = 0 : i64, scratch_operands = 1 : i64, tpu.core_type = #tpu.core_type<tc>, window_params = [{pipeline_mode = #tpu.pipeline_mode<synchronous>, transform_indices = @transform_0, window_bounds = array<i64: 16, 1>}, {pipeline_mode = #tpu.pipeline_mode<synchronous>, transform_indices = @transform_1, window_bounds = array<i64: 1, 16>}, {pipeline_mode = #tpu.pipeline_mode<synchronous>, transform_indices = @transform_2, window_bounds = array<i64: 128, 16>}, {pipeline_mode = #tpu.pipeline_mode<synchronous>, transform_indices = @transform_3, window_bounds = array<i64: 16, 32>}, {pipeline_mode = #tpu.pipeline_mode<synchronous>, transform_indices = @transform_4, window_bounds = array<i64: 16, 32>}, {pipeline_mode = #tpu.pipeline_mode<synchronous>, transform_indices = @transform_5, window_bounds = array<i64: 128, 32>}, {pipeline_mode = #tpu.pipeline_mode<synchronous>, transform_indices = @transform_6, window_bounds = array<i64: 128, 16>}, {transform_indices = @transform_7, window_bounds = array<i64: 1, 32, 32>}, {transform_indices = @transform_8, window_bounds = array<i64: 1, 32, 32>}, {transform_indices = @transform_9, window_bounds = array<i64: 1, 32, 32>}, {transform_indices = @transform_10, window_bounds = array<i64: 1, 1, 32>}, {transform_indices = @transform_11, window_bounds = array<i64: 1, 1, 32>}, {transform_indices = @transform_12, window_bounds = array<i64: 1, 1, 32>}, {transform_indices = @transform_13, window_bounds = array<i64: 1, 32, 32>}, {transform_indices = @transform_14, window_bounds = array<i64: 1, 1, 32>}, {transform_indices = @transform_15, window_bounds = array<i64: 1, 1, 32>}, {transform_indices = @transform_16, window_bounds = array<i64: 1, 1, 32>}, {transform_indices = @transform_17, window_bounds = array<i64: 1, 32, 2048>}, {transform_indices = @transform_18, window_bounds = array<i64: 1, 1, 2048>}, {transform_indices = @transform_19, window_bounds = array<i64: 1, 32, 2048>}, {transform_indices = @transform_20, window_bounds = array<i64: 1, 1, 32>}, {transform_indices = @transform_21, window_bounds = array<i64: 1, 1, 32>}, {transform_indices = @transform_22, window_bounds = array<i64: 1, 1, 32>}, {pipeline_mode = #tpu.pipeline_mode<synchronous>, transform_indices = @transform_23, window_bounds = array<i64: 16, 32>}]} {
    %c0_i32 = arith.constant 0 : i32
    %0 = arith.cmpi eq, %arg0, %c0_i32 : i32
    %1 = arith.extui %0 : i1 to i32
    %c0_i32_0 = arith.constant 0 : i32
    %2 = arith.cmpi ne, %1, %c0_i32_0 : i32
    scf.if %2 {
      %c0_87 = arith.constant 0 : index
      %c0_88 = arith.constant 0 : index
      %136 = vector.load %arg1[%c0_87, %c0_88] : memref<16x1xi32, #tpu.memory_space<vmem>>, vector<16x1xi32>
      %137 = tpu.iota {dimensions = array<i32: 1>} : vector<16x16xi32>
      %138 = vector.broadcast %136 : vector<16x1xi32> to vector<16x16xi32>
      %139 = arith.cmpi eq, %138, %137 : vector<16x16xi32>
      %140 = arith.extui %139 : vector<16x16xi1> to vector<16x16xi32>
      %141 = arith.sitofp %140 : vector<16x16xi32> to vector<16x16xf32>
      %c0_89 = arith.constant 0 : index
      %c0_90 = arith.constant 0 : index
      %142 = vector.load %arg4[%c0_89, %c0_90] : memref<16x32xf32, #tpu.memory_space<vmem>>, vector<16x32xf32>
      %cst_91 = arith.constant dense<0.000000e+00> : vector<16x32xf32>
      %143 = tpu.matmul %141, %142, %cst_91 {dimension_numbers = #tpu.dot_dimension_numbers<[1], [0], [0], [1], [0, 0, 1, 1], [], []>} : vector<16x16xf32>, vector<16x32xf32>, vector<16x32xf32> -> vector<16x32xf32>
      %c0_92 = arith.constant 0 : index
      %c0_93 = arith.constant 0 : index
      %144 = vector.load %arg5[%c0_92, %c0_93] : memref<16x32xf32, #tpu.memory_space<vmem>>, vector<16x32xf32>
      %145 = arith.addf %143, %144 : vector<16x32xf32>
      %c0_94 = arith.constant 0 : index
      %c0_95 = arith.constant 0 : index
      %146 = vector.load %arg25[%c0_94, %c0_95] : memref<16x32xf32, #tpu.memory_space<vmem>>, vector<16x32xf32>
      tpu.vector_store %arg25[%c0_94, %c0_95], %145 {strides = array<i32>} : memref<16x32xf32, #tpu.memory_space<vmem>>, vector<16x32xf32>,
    } else {
    }
    %c0 = arith.constant 0 : index
    %c0_1 = arith.constant 0 : index
    %3 = vector.load %arg25[%c0, %c0_1] : memref<16x32xf32, #tpu.memory_space<vmem>>, vector<16x32xf32>
    %c0_2 = arith.constant 0 : index
    %c0_3 = arith.constant 0 : index
    %4 = vector.load %arg2[%c0_2, %c0_3] : memref<1x16xi32, #tpu.memory_space<vmem>>, vector<1x16xi32>
    %c1_i32 = arith.constant 1 : i32
    %5 = vector.broadcast %c1_i32 : i32 to vector<1x16xi32>
    %6 = arith.cmpi eq, %4, %5 : vector<1x16xi32>
    %c0_4 = arith.constant 0 : index
    %c0_5 = arith.constant 0 : index
    %7 = vector.load %arg3[%c0_4, %c0_5] : memref<128x16xf32, #tpu.memory_space<vmem>>, vector<128x16xf32>
    %cst = arith.constant -1.000000e+30 : f32
    %8 = vector.shape_cast %6 : vector<1x16xi1> to vector<1x16xi1>
    %9 = vector.broadcast %8 : vector<1x16xi1> to vector<128x16xi1>
    %10 = vector.broadcast %cst : f32 to vector<128x16xf32>
    %11 = arith.select %9, %10, %7 : vector<128x16xi1>, vector<128x16xf32>
    %c0_6 = arith.constant 0 : index
    %c0_7 = arith.constant 0 : index
    %12 = vector.load %arg6[%c0_6, %c0_7] : memref<128x32xf32, #tpu.memory_space<vmem>>, vector<128x32xf32>
    %c0_8 = arith.constant 0 : index
    %c0_9 = arith.constant 0 : index
    %13 = vector.load %arg7[%c0_8, %c0_9] : memref<128x16xf32, #tpu.memory_space<vmem>>, vector<128x16xf32>
    %c0_10 = arith.constant 0 : index
    %c0_11 = arith.constant 0 : index
    %c0_12 = arith.constant 0 : index
    %14 = vector.load %arg8[%c0_10, %c0_11, %c0_12] : memref<1x32x32xf32, #tpu.memory_space<vmem>>, vector<1x32x32xf32>
    %15 = vector.shape_cast %14 : vector<1x32x32xf32> to vector<32x32xf32>
    %cst_13 = arith.constant dense<0.000000e+00> : vector<16x32xf32>
    %16 = tpu.matmul %3, %15, %cst_13 {dimension_numbers = #tpu.dot_dimension_numbers<[1], [0], [0], [1], [0, 0, 1, 1], [], []>} : vector<16x32xf32>, vector<32x32xf32>, vector<16x32xf32> -> vector<16x32xf32>
    %c0_14 = arith.constant 0 : index
    %c0_15 = arith.constant 0 : index
    %c0_16 = arith.constant 0 : index
    %17 = vector.load %arg11[%c0_14, %c0_15, %c0_16] : memref<1x1x32xf32, #tpu.memory_space<vmem>>, vector<1x1x32xf32>
    %18 = vector.shape_cast %17 : vector<1x1x32xf32> to vector<1x32xf32>
    %19 = vector.broadcast %18 : vector<1x32xf32> to vector<16x32xf32>
    %20 = arith.addf %16, %19 : vector<16x32xf32>
    %c0_17 = arith.constant 0 : index
    %c0_18 = arith.constant 0 : index
    %c0_19 = arith.constant 0 : index
    %21 = vector.load %arg9[%c0_17, %c0_18, %c0_19] : memref<1x32x32xf32, #tpu.memory_space<vmem>>, vector<1x32x32xf32>
    %22 = vector.shape_cast %21 : vector<1x32x32xf32> to vector<32x32xf32>
    %cst_20 = arith.constant dense<0.000000e+00> : vector<16x32xf32>
    %23 = tpu.matmul %3, %22, %cst_20 {dimension_numbers = #tpu.dot_dimension_numbers<[1], [0], [0], [1], [0, 0, 1, 1], [], []>} : vector<16x32xf32>, vector<32x32xf32>, vector<16x32xf32> -> vector<16x32xf32>
    %c0_21 = arith.constant 0 : index
    %c0_22 = arith.constant 0 : index
    %c0_23 = arith.constant 0 : index
    %24 = vector.load %arg12[%c0_21, %c0_22, %c0_23] : memref<1x1x32xf32, #tpu.memory_space<vmem>>, vector<1x1x32xf32>
    %25 = vector.shape_cast %24 : vector<1x1x32xf32> to vector<1x32xf32>
    %26 = vector.broadcast %25 : vector<1x32xf32> to vector<16x32xf32>
    %27 = arith.addf %23, %26 : vector<16x32xf32>
    %c0_24 = arith.constant 0 : index
    %c0_25 = arith.constant 0 : index
    %c0_26 = arith.constant 0 : index
    %28 = vector.load %arg10[%c0_24, %c0_25, %c0_26] : memref<1x32x32xf32, #tpu.memory_space<vmem>>, vector<1x32x32xf32>
    %29 = vector.shape_cast %28 : vector<1x32x32xf32> to vector<32x32xf32>
    %cst_27 = arith.constant dense<0.000000e+00> : vector<16x32xf32>
    %30 = tpu.matmul %3, %29, %cst_27 {dimension_numbers = #tpu.dot_dimension_numbers<[1], [0], [0], [1], [0, 0, 1, 1], [], []>} : vector<16x32xf32>, vector<32x32xf32>, vector<16x32xf32> -> vector<16x32xf32>
    %c0_28 = arith.constant 0 : index
    %c0_29 = arith.constant 0 : index
    %c0_30 = arith.constant 0 : index
    %31 = vector.load %arg13[%c0_28, %c0_29, %c0_30] : memref<1x1x32xf32, #tpu.memory_space<vmem>>, vector<1x1x32xf32>
    %32 = vector.shape_cast %31 : vector<1x1x32xf32> to vector<1x32xf32>
    %33 = vector.broadcast %32 : vector<1x32xf32> to vector<16x32xf32>
    %34 = arith.addf %30, %33 : vector<16x32xf32>
    %cst_31 = arith.constant dense<0.000000e+00> : vector<128x32xf32>
    %35 = tpu.matmul %13, %20, %cst_31 {dimension_numbers = #tpu.dot_dimension_numbers<[1], [0], [0], [1], [0, 0, 1, 1], [], []>} : vector<128x16xf32>, vector<16x32xf32>, vector<128x32xf32> -> vector<128x32xf32>
    %36 = arith.mulf %35, %12 : vector<128x32xf32>
    %cst_32 = arith.constant dense<0.000000e+00> : vector<128x16xf32>
    %37 = tpu.matmul %36, %27, %cst_32 {dimension_numbers = #tpu.dot_dimension_numbers<[1], [1], [0], [0], [0, 0, 1, 0], [], []>} : vector<128x32xf32>, vector<16x32xf32>, vector<128x16xf32> -> vector<128x16xf32>
    %38 = arith.addf %37, %11 : vector<128x16xf32>
    %cst_33 = arith.constant dense<0xFF800000> : vector<128xf32>
    %39 = vector.multi_reduction <maximumf>, %38, %cst_33 [1] : vector<128x16xf32> to vector<128xf32>
    %40 = vector.shape_cast %39 : vector<128xf32> to vector<128x1xf32>
    %41 = vector.broadcast %40 : vector<128x1xf32> to vector<128x16xf32>
    %42 = arith.subf %38, %41 : vector<128x16xf32>
    %43 = math.exp %42 : vector<128x16xf32>
    %cst_34 = arith.constant dense<0.000000e+00> : vector<128xf32>
    %44 = vector.multi_reduction <add>, %43, %cst_34 [1] : vector<128x16xf32> to vector<128xf32>
    %45 = vector.shape_cast %44 : vector<128xf32> to vector<128x1xf32>
    %46 = vector.broadcast %45 : vector<128x1xf32> to vector<128x16xf32>
    %47 = arith.divf %43, %46 : vector<128x16xf32>
    %cst_35 = arith.constant dense<0.000000e+00> : vector<128x32xf32>
    %48 = tpu.matmul %47, %34, %cst_35 {dimension_numbers = #tpu.dot_dimension_numbers<[1], [0], [0], [1], [0, 0, 1, 1], [], []>} : vector<128x16xf32>, vector<16x32xf32>, vector<128x32xf32> -> vector<128x32xf32>
    %49 = arith.mulf %48, %12 : vector<128x32xf32>
    %cst_36 = arith.constant dense<0.000000e+00> : vector<16x32xf32>
    %50 = tpu.matmul %13, %49, %cst_36 {dimension_numbers = #tpu.dot_dimension_numbers<[0], [0], [1], [1], [0, 1, 1, 1], [], []>} : vector<128x16xf32>, vector<128x32xf32>, vector<16x32xf32> -> vector<16x32xf32>
    %c0_37 = arith.constant 0 : index
    %c0_38 = arith.constant 0 : index
    %c0_39 = arith.constant 0 : index
    %51 = vector.load %arg14[%c0_37, %c0_38, %c0_39] : memref<1x32x32xf32, #tpu.memory_space<vmem>>, vector<1x32x32xf32>
    %52 = vector.shape_cast %51 : vector<1x32x32xf32> to vector<32x32xf32>
    %cst_40 = arith.constant dense<0.000000e+00> : vector<16x32xf32>
    %53 = tpu.matmul %50, %52, %cst_40 {dimension_numbers = #tpu.dot_dimension_numbers<[1], [0], [0], [1], [0, 0, 1, 1], [], []>} : vector<16x32xf32>, vector<32x32xf32>, vector<16x32xf32> -> vector<16x32xf32>
    %c0_41 = arith.constant 0 : index
    %c0_42 = arith.constant 0 : index
    %c0_43 = arith.constant 0 : index
    %54 = vector.load %arg15[%c0_41, %c0_42, %c0_43] : memref<1x1x32xf32, #tpu.memory_space<vmem>>, vector<1x1x32xf32>
    %55 = vector.shape_cast %54 : vector<1x1x32xf32> to vector<1x32xf32>
    %56 = vector.broadcast %55 : vector<1x32xf32> to vector<16x32xf32>
    %57 = arith.addf %53, %56 : vector<16x32xf32>
    %58 = arith.addf %3, %57 : vector<16x32xf32>
    %c0_44 = arith.constant 0 : index
    %c0_45 = arith.constant 0 : index
    %c0_46 = arith.constant 0 : index
    %59 = vector.load %arg16[%c0_44, %c0_45, %c0_46] : memref<1x1x32xf32, #tpu.memory_space<vmem>>, vector<1x1x32xf32>
    %60 = vector.shape_cast %59 : vector<1x1x32xf32> to vector<1x32xf32>
    %c0_47 = arith.constant 0 : index
    %c0_48 = arith.constant 0 : index
    %c0_49 = arith.constant 0 : index
    %61 = vector.load %arg17[%c0_47, %c0_48, %c0_49] : memref<1x1x32xf32, #tpu.memory_space<vmem>>, vector<1x1x32xf32>
    %62 = vector.shape_cast %61 : vector<1x1x32xf32> to vector<1x32xf32>
    %cst_50 = arith.constant dense<0.000000e+00> : vector<16xf32>
    %63 = vector.multi_reduction <add>, %58, %cst_50 [1] : vector<16x32xf32> to vector<16xf32>
    %64 = vector.shape_cast %63 : vector<16xf32> to vector<16x1xf32>
    %cst_51 = arith.constant 3.200000e+01 : f32
    %65 = vector.broadcast %cst_51 : f32 to vector<16x1xf32>
    %66 = arith.divf %64, %65 : vector<16x1xf32>
    %67 = arith.mulf %58, %58 : vector<16x32xf32>
    %cst_52 = arith.constant dense<0.000000e+00> : vector<16xf32>
    %68 = vector.multi_reduction <add>, %67, %cst_52 [1] : vector<16x32xf32> to vector<16xf32>
    %69 = vector.shape_cast %68 : vector<16xf32> to vector<16x1xf32>
    %cst_53 = arith.constant 3.200000e+01 : f32
    %70 = vector.broadcast %cst_53 : f32 to vector<16x1xf32>
    %71 = arith.divf %69, %70 : vector<16x1xf32>
    %72 = arith.mulf %66, %66 : vector<16x1xf32>
    %73 = arith.subf %71, %72 : vector<16x1xf32>
    %cst_54 = arith.constant 0.000000e+00 : f32
    %74 = vector.broadcast %cst_54 : f32 to vector<16x1xf32>
    %75 = arith.maximumf %73, %74 : vector<16x1xf32>
    %76 = vector.broadcast %66 : vector<16x1xf32> to vector<16x32xf32>
    %77 = arith.subf %58, %76 : vector<16x32xf32>
    %cst_55 = arith.constant 9.99999974E-6 : f32
    %78 = vector.broadcast %cst_55 : f32 to vector<16x1xf32>
    %79 = arith.addf %75, %78 : vector<16x1xf32>
    %80 = math.rsqrt %79 : vector<16x1xf32>
    %81 = vector.broadcast %80 : vector<16x1xf32> to vector<16x32xf32>
    %82 = arith.mulf %77, %81 : vector<16x32xf32>
    %83 = vector.broadcast %60 : vector<1x32xf32> to vector<16x32xf32>
    %84 = arith.mulf %82, %83 : vector<16x32xf32>
    %85 = vector.broadcast %62 : vector<1x32xf32> to vector<16x32xf32>
    %86 = arith.addf %84, %85 : vector<16x32xf32>
    %c0_56 = arith.constant 0 : index
    %c0_57 = arith.constant 0 : index
    %c0_58 = arith.constant 0 : index
    %87 = vector.load %arg18[%c0_56, %c0_57, %c0_58] : memref<1x32x2048xbf16, #tpu.memory_space<vmem>>, vector<1x32x2048xbf16>
    %88 = vector.shape_cast %87 : vector<1x32x2048xbf16> to vector<32x2048xbf16>
    %89 = arith.extf %88 : vector<32x2048xbf16> to vector<32x2048xf32>
    %c0_59 = arith.constant 0 : index
    %c0_60 = arith.constant 0 : index
    %c0_61 = arith.constant 0 : index
    %90 = vector.load %arg20[%c0_59, %c0_60, %c0_61] : memref<1x32x2048xbf16, #tpu.memory_space<vmem>>, vector<1x32x2048xbf16>
    %91 = vector.shape_cast %90 : vector<1x32x2048xbf16> to vector<32x2048xbf16>
    %92 = arith.extf %91 : vector<32x2048xbf16> to vector<32x2048xf32>
    %cst_62 = arith.constant dense<0.000000e+00> : vector<16x2048xf32>
    %93 = tpu.matmul %86, %89, %cst_62 {dimension_numbers = #tpu.dot_dimension_numbers<[1], [0], [0], [1], [0, 0, 1, 1], [], []>} : vector<16x32xf32>, vector<32x2048xf32>, vector<16x2048xf32> -> vector<16x2048xf32>
    %c0_63 = arith.constant 0 : index
    %c0_64 = arith.constant 0 : index
    %c0_65 = arith.constant 0 : index
    %94 = vector.load %arg19[%c0_63, %c0_64, %c0_65] : memref<1x1x2048xf32, #tpu.memory_space<vmem>>, vector<1x1x2048xf32>
    %95 = vector.shape_cast %94 : vector<1x1x2048xf32> to vector<1x2048xf32>
    %96 = vector.broadcast %95 : vector<1x2048xf32> to vector<16x2048xf32>
    %97 = arith.addf %93, %96 : vector<16x2048xf32>
    %cst_66 = arith.constant 0.000000e+00 : f32
    %98 = vector.broadcast %cst_66 : f32 to vector<16x2048xf32>
    %99 = arith.maximumf %97, %98 : vector<16x2048xf32>
    %cst_67 = arith.constant dense<0.000000e+00> : vector<16x32xf32>
    %100 = tpu.matmul %99, %92, %cst_67 {dimension_numbers = #tpu.dot_dimension_numbers<[1], [1], [0], [0], [0, 0, 1, 0], [], []>} : vector<16x2048xf32>, vector<32x2048xf32>, vector<16x32xf32> -> vector<16x32xf32>
    %c0_68 = arith.constant 0 : index
    %c0_69 = arith.constant 0 : index
    %c0_70 = arith.constant 0 : index
    %101 = vector.load %arg21[%c0_68, %c0_69, %c0_70] : memref<1x1x32xf32, #tpu.memory_space<vmem>>, vector<1x1x32xf32>
    %102 = vector.shape_cast %101 : vector<1x1x32xf32> to vector<1x32xf32>
    %103 = vector.broadcast %102 : vector<1x32xf32> to vector<16x32xf32>
    %104 = arith.addf %100, %103 : vector<16x32xf32>
    %105 = arith.addf %86, %104 : vector<16x32xf32>
    %c0_71 = arith.constant 0 : index
    %c0_72 = arith.constant 0 : index
    %c0_73 = arith.constant 0 : index
    %106 = vector.load %arg22[%c0_71, %c0_72, %c0_73] : memref<1x1x32xf32, #tpu.memory_space<vmem>>, vector<1x1x32xf32>
    %107 = vector.shape_cast %106 : vector<1x1x32xf32> to vector<1x32xf32>
    %c0_74 = arith.constant 0 : index
    %c0_75 = arith.constant 0 : index
    %c0_76 = arith.constant 0 : index
    %108 = vector.load %arg23[%c0_74, %c0_75, %c0_76] : memref<1x1x32xf32, #tpu.memory_space<vmem>>, vector<1x1x32xf32>
    %109 = vector.shape_cast %108 : vector<1x1x32xf32> to vector<1x32xf32>
    %cst_77 = arith.constant dense<0.000000e+00> : vector<16xf32>
    %110 = vector.multi_reduction <add>, %105, %cst_77 [1] : vector<16x32xf32> to vector<16xf32>
    %111 = vector.shape_cast %110 : vector<16xf32> to vector<16x1xf32>
    %cst_78 = arith.constant 3.200000e+01 : f32
    %112 = vector.broadcast %cst_78 : f32 to vector<16x1xf32>
    %113 = arith.divf %111, %112 : vector<16x1xf32>
    %114 = arith.mulf %105, %105 : vector<16x32xf32>
    %cst_79 = arith.constant dense<0.000000e+00> : vector<16xf32>
    %115 = vector.multi_reduction <add>, %114, %cst_79 [1] : vector<16x32xf32> to vector<16xf32>
    %116 = vector.shape_cast %115 : vector<16xf32> to vector<16x1xf32>
    %cst_80 = arith.constant 3.200000e+01 : f32
    %117 = vector.broadcast %cst_80 : f32 to vector<16x1xf32>
    %118 = arith.divf %116, %117 : vector<16x1xf32>
    %119 = arith.mulf %113, %113 : vector<16x1xf32>
    %120 = arith.subf %118, %119 : vector<16x1xf32>
    %cst_81 = arith.constant 0.000000e+00 : f32
    %121 = vector.broadcast %cst_81 : f32 to vector<16x1xf32>
    %122 = arith.maximumf %120, %121 : vector<16x1xf32>
    %123 = vector.broadcast %113 : vector<16x1xf32> to vector<16x32xf32>
    %124 = arith.subf %105, %123 : vector<16x32xf32>
    %cst_82 = arith.constant 9.99999974E-6 : f32
    %125 = vector.broadcast %cst_82 : f32 to vector<16x1xf32>
    %126 = arith.addf %122, %125 : vector<16x1xf32>
    %127 = math.rsqrt %126 : vector<16x1xf32>
    %128 = vector.broadcast %127 : vector<16x1xf32> to vector<16x32xf32>
    %129 = arith.mulf %124, %128 : vector<16x32xf32>
    %130 = vector.broadcast %107 : vector<1x32xf32> to vector<16x32xf32>
    %131 = arith.mulf %129, %130 : vector<16x32xf32>
    %132 = vector.broadcast %109 : vector<1x32xf32> to vector<16x32xf32>
    %133 = arith.addf %131, %132 : vector<16x32xf32>
    %c0_83 = arith.constant 0 : index
    %c0_84 = arith.constant 0 : index
    %134 = vector.load %arg25[%c0_83, %c0_84] : memref<16x32xf32, #tpu.memory_space<vmem>>, vector<16x32xf32>
    tpu.vector_store %arg25[%c0_83, %c0_84], %133 {strides = array<i32>} : memref<16x32xf32, #tpu.memory_space<vmem>>, vector<16x32xf32>,
    %c0_85 = arith.constant 0 : index
    %c0_86 = arith.constant 0 : index
    %135 = vector.load %arg24[%c0_85, %c0_86] : memref<16x32xf32, #tpu.memory_space<vmem>>, vector<16x32xf32>
    tpu.vector_store %arg24[%c0_85, %c0_86], %133 {strides = array<i32>} : memref<16x32xf32, #tpu.memory_space<vmem>>, vector<16x32xf32>,
    return
  }
  func.func @transform_0(%arg0: i32) -> (i32, i32) {
    %c0_i32 = arith.constant 0 : i32
    %c0_i32_0 = arith.constant 0 : i32
    %c0_i32_1 = arith.constant 0 : i32
    return %c0_i32, %c0_i32_0 : i32, i32
  }
  func.func @transform_1(%arg0: i32) -> (i32, i32) {
    %c0_i32 = arith.constant 0 : i32
    %c0_i32_0 = arith.constant 0 : i32
    %c0_i32_1 = arith.constant 0 : i32
    return %c0_i32, %c0_i32_0 : i32, i32
  }
  func.func @transform_2(%arg0: i32) -> (i32, i32) {
    %c0_i32 = arith.constant 0 : i32
    %c0_i32_0 = arith.constant 0 : i32
    %c0_i32_1 = arith.constant 0 : i32
    return %c0_i32, %c0_i32_0 : i32, i32
  }
  func.func @transform_3(%arg0: i32) -> (i32, i32) {
    %c0_i32 = arith.constant 0 : i32
    %c0_i32_0 = arith.constant 0 : i32
    %c0_i32_1 = arith.constant 0 : i32
    return %c0_i32, %c0_i32_0 : i32, i32
  }
  func.func @transform_4(%arg0: i32) -> (i32, i32) {
    %c0_i32 = arith.constant 0 : i32
    %c0_i32_0 = arith.constant 0 : i32
    %c0_i32_1 = arith.constant 0 : i32
    return %c0_i32, %c0_i32_0 : i32, i32
  }
  func.func @transform_5(%arg0: i32) -> (i32, i32) {
    %c0_i32 = arith.constant 0 : i32
    %c0_i32_0 = arith.constant 0 : i32
    %c0_i32_1 = arith.constant 0 : i32
    return %c0_i32, %c0_i32_0 : i32, i32
  }
  func.func @transform_6(%arg0: i32) -> (i32, i32) {
    %c0_i32 = arith.constant 0 : i32
    %c0_i32_0 = arith.constant 0 : i32
    %c0_i32_1 = arith.constant 0 : i32
    return %c0_i32, %c0_i32_0 : i32, i32
  }
  func.func @transform_7(%arg0: i32) -> (i32, i32, i32) {
    %c0_i32 = arith.constant 0 : i32
    %c0_i32_0 = arith.constant 0 : i32
    %c0_i32_1 = arith.constant 0 : i32
    return %arg0, %c0_i32, %c0_i32_0 : i32, i32, i32
  }
  func.func @transform_8(%arg0: i32) -> (i32, i32, i32) {
    %c0_i32 = arith.constant 0 : i32
    %c0_i32_0 = arith.constant 0 : i32
    %c0_i32_1 = arith.constant 0 : i32
    return %arg0, %c0_i32, %c0_i32_0 : i32, i32, i32
  }
  func.func @transform_9(%arg0: i32) -> (i32, i32, i32) {
    %c0_i32 = arith.constant 0 : i32
    %c0_i32_0 = arith.constant 0 : i32
    %c0_i32_1 = arith.constant 0 : i32
    return %arg0, %c0_i32, %c0_i32_0 : i32, i32, i32
  }
  func.func @transform_10(%arg0: i32) -> (i32, i32, i32) {
    %c0_i32 = arith.constant 0 : i32
    %c0_i32_0 = arith.constant 0 : i32
    %c0_i32_1 = arith.constant 0 : i32
    return %arg0, %c0_i32, %c0_i32_0 : i32, i32, i32
  }
  func.func @transform_11(%arg0: i32) -> (i32, i32, i32) {
    %c0_i32 = arith.constant 0 : i32
    %c0_i32_0 = arith.constant 0 : i32
    %c0_i32_1 = arith.constant 0 : i32
    return %arg0, %c0_i32, %c0_i32_0 : i32, i32, i32
  }
  func.func @transform_12(%arg0: i32) -> (i32, i32, i32) {
    %c0_i32 = arith.constant 0 : i32
    %c0_i32_0 = arith.constant 0 : i32
    %c0_i32_1 = arith.constant 0 : i32
    return %arg0, %c0_i32, %c0_i32_0 : i32, i32, i32
  }
  func.func @transform_13(%arg0: i32) -> (i32, i32, i32) {
    %c0_i32 = arith.constant 0 : i32
    %c0_i32_0 = arith.constant 0 : i32
    %c0_i32_1 = arith.constant 0 : i32
    return %arg0, %c0_i32, %c0_i32_0 : i32, i32, i32
  }
  func.func @transform_14(%arg0: i32) -> (i32, i32, i32) {
    %c0_i32 = arith.constant 0 : i32
    %c0_i32_0 = arith.constant 0 : i32
    %c0_i32_1 = arith.constant 0 : i32
    return %arg0, %c0_i32, %c0_i32_0 : i32, i32, i32
  }
  func.func @transform_15(%arg0: i32) -> (i32, i32, i32) {
    %c0_i32 = arith.constant 0 : i32
    %c0_i32_0 = arith.constant 0 : i32
    %c0_i32_1 = arith.constant 0 : i32
    return %arg0, %c0_i32, %c0_i32_0 : i32, i32, i32
  }
  func.func @transform_16(%arg0: i32) -> (i32, i32, i32) {
    %c0_i32 = arith.constant 0 : i32
    %c0_i32_0 = arith.constant 0 : i32
    %c0_i32_1 = arith.constant 0 : i32
    return %arg0, %c0_i32, %c0_i32_0 : i32, i32, i32
  }
  func.func @transform_17(%arg0: i32) -> (i32, i32, i32) {
    %c0_i32 = arith.constant 0 : i32
    %c0_i32_0 = arith.constant 0 : i32
    %c0_i32_1 = arith.constant 0 : i32
    return %arg0, %c0_i32, %c0_i32_0 : i32, i32, i32
  }
  func.func @transform_18(%arg0: i32) -> (i32, i32, i32) {
    %c0_i32 = arith.constant 0 : i32
    %c0_i32_0 = arith.constant 0 : i32
    %c0_i32_1 = arith.constant 0 : i32
    return %arg0, %c0_i32, %c0_i32_0 : i32, i32, i32
  }
  func.func @transform_19(%arg0: i32) -> (i32, i32, i32) {
    %c0_i32 = arith.constant 0 : i32
    %c0_i32_0 = arith.constant 0 : i32
    %c0_i32_1 = arith.constant 0 : i32
    return %arg0, %c0_i32, %c0_i32_0 : i32, i32, i32
  }
  func.func @transform_20(%arg0: i32) -> (i32, i32, i32) {
    %c0_i32 = arith.constant 0 : i32
    %c0_i32_0 = arith.constant 0 : i32
    %c0_i32_1 = arith.constant 0 : i32
    return %arg0, %c0_i32, %c0_i32_0 : i32, i32, i32
  }
  func.func @transform_21(%arg0: i32) -> (i32, i32, i32) {
    %c0_i32 = arith.constant 0 : i32
    %c0_i32_0 = arith.constant 0 : i32
    %c0_i32_1 = arith.constant 0 : i32
    return %arg0, %c0_i32, %c0_i32_0 : i32, i32, i32
  }
  func.func @transform_22(%arg0: i32) -> (i32, i32, i32) {
    %c0_i32 = arith.constant 0 : i32
    %c0_i32_0 = arith.constant 0 : i32
    %c0_i32_1 = arith.constant 0 : i32
    return %arg0, %c0_i32, %c0_i32_0 : i32, i32, i32
  }
  func.func @transform_23(%arg0: i32) -> (i32, i32) {
    %c0_i32 = arith.constant 0 : i32
    %c0_i32_0 = arith.constant 0 : i32
    %c0_i32_1 = arith.constant 0 : i32
    return %c0_i32, %c0_i32_0 : i32, i32
  }
}

</mosaic_0001>

<bundles_post_ra>
// kernel: tpu_custom_call.1
= control target key start
LH: loop header
LB: loop body
LE: loop exit
PB: predicated region body
PF: predicated region fallthrough
CT: control target
= control target key end

     0   :  { %s6140_s0 = inlined_call_operand.vmem [shape: s32[16,1], index: 0, kind: input, shape index: {}]   ;;  %s6141_s1 = inlined_call_operand.vmem [shape: s32[1,16], index: 1, kind: input, shape index: {}]   ;;  %s6142_s2 = inlined_call_operand.vmem [shape: f32[128,16], index: 2, kind: input, shape index: {}]   ;;  %s6143_s3 = inlined_call_operand.vmem [shape: f32[16,32], index: 3, kind: input, shape index: {}]   ;;  %s6144_s4 = inlined_call_operand.vmem [shape: f32[16,32], index: 4, kind: input, shape index: {}]   ;;  %s6145_s5 = inlined_call_operand.vmem [shape: f32[128,32], index: 5, kind: input, shape index: {}]   ;;  %s6146_s6 = inlined_call_operand.vmem [shape: f32[128,16], index: 6, kind: input, shape index: {}]   ;;  %s6147_s7 = inlined_call_operand.vmem [shape: f32[2,32,32], index: 7, kind: input, shape index: {}]   ;;  %s6148_s8 = inlined_call_operand.vmem [shape: f32[2,32,32], index: 8, kind: input, shape index: {}]   ;;  %s6149_s9 = inlined_call_operand.vmem [shape: f32[2,32,32], index: 9, kind: input, shape index: {}]   ;;  %s6150_s10 = inlined_call_operand.vmem [shape: f32[2,1,32], index: 10, kind: input, shape index: {}]   ;;  %s6151_s11 = inlined_call_operand.vmem [shape: f32[2,1,32], index: 11, kind: input, shape index: {}]   ;;  %s6152_s12 = inlined_call_operand.vmem [shape: f32[2,1,32], index: 12, kind: input, shape index: {}]   ;;  %s6153_s13 = inlined_call_operand.vmem [shape: f32[2,32,32], index: 13, kind: input, shape index: {}]   ;;  %s6154_s14 = inlined_call_operand.vmem [shape: f32[2,1,32], index: 14, kind: input, shape index: {}]   ;;  %s6155_s15 = inlined_call_operand.vmem [shape: f32[2,1,32], index: 15, kind: input, shape index: {}]   ;;  %s6156_s16 = inlined_call_operand.vmem [shape: f32[2,1,32], index: 16, kind: input, shape index: {}]   ;;  %s6157_s17 = inlined_call_operand.hbm [shape: bf16[2,32,2048], index: 17, kind: input, shape index: {}]   ;;  %s6158_s18 = inlined_call_operand.vmem [shape: f32[2,1,2048], index: 18, kind: input, shape index: {}]   ;;  %s6159_s19 = inlined_call_operand.hbm [shape: bf16[2,32,2048], index: 19, kind: input, shape index: {}]   ;;  %s6160_s20 = inlined_call_operand.vmem [shape: f32[2,1,32], index: 20, kind: input, shape index: {}]   ;;  %s6161_s21 = inlined_call_operand.vmem [shape: f32[2,1,32], index: 21, kind: input, shape index: {}]   ;;  %s6162_s22 = inlined_call_operand.vmem [shape: f32[2,1,32], index: 22, kind: input, shape index: {}]   ;;  %s6163_s23 = inlined_call_operand.hbm [shape: f32[16,32], index: 23, kind: output, shape index: {}]  }
   0x1   :  { %6179 = sst [smem:[#allocation18_spill]] %s6140_s0 }
   0x2   :  { %6180 = sst [smem:[#allocation19_spill]] %s6141_s1 }
   0x3   :  { %6181 = sst [smem:[#allocation20_spill]] %s6142_s2 }
   0x4   :  { %6182 = sst [smem:[#allocation21_spill]] %s6143_s3 }
   0x5   :  { %6183 = sst [smem:[#allocation22_spill]] %s6144_s4 }
   0x6   :  { %6184 = sst [smem:[#allocation23_spill]] %s6145_s5 }
   0x7   :  { %6185 = sst [smem:[#allocation24_spill]] %s6146_s6 }
   0x8   :  { %6186 = sst [smem:[#allocation25_spill]] %s6147_s7 }
   0x9   :  { %6187 = sst [smem:[#allocation26_spill]] %s6148_s8 }
   0xa   :  { %6188 = sst [smem:[#allocation27_spill]] %s6149_s9 }
   0xb   :  { %6189 = sst [smem:[#allocation28_spill]] %s6153_s13 }
   0xc   :  { %6190 = sst [smem:[#allocation29_spill]] %s6155_s15 }
   0xd   :  { %6191 = sst [smem:[#allocation30_spill]] %s6157_s17 }
   0xe   :  { %6192 = sst [smem:[#allocation31_spill]] %s6158_s18 }
   0xf   :  { %6193 = sst [smem:[#allocation32_spill]] %s6159_s19 }
  0x10   :  { %6194 = sst [smem:[#allocation33_spill]] %s6161_s21 }
  0x11   :  { %6195 = sst [smem:[#allocation34_spill]] %s6162_s22 }
  0x12   :  { %6196 = sst [smem:[#allocation35_spill]] %s6163_s23 }
  0x13   :  { %28 = vsyncpa [#allocation4], 0 }
  0x14   :  { %30 = vsyncpa [#allocation4 + $0x1], 0 }
  0x15   :  { %31 = vsyncpa [#allocation7], 0 }
  0x16   :  { %33 = vsyncpa [#allocation7 + $0x1], 0 }
  0x17   :  { %34 = vsyncpa [#allocation5], 0  ;;  %s5068_s4 = smov 0   ;;  %s5070_s30 = smov 0  }
  0x18   :  { %s5072_s24 = smov 0   ;;  %s5074_s25 = smov 0  }
  0x19 LB: > { %6197 = sst [smem:[#allocation12_spill]] %s4927_s30  ;;  %s5087_s5 = sadd.s32 4294967295, %s4935_s25   ;;  %s4935_s25 = sphi %s5074_s25, %s6245_s25   ;;  %s4931_s24 = sphi %s5072_s24, %s6248_s24   ;;  %s4927_s30 = sphi %s5070_s30, %s6247_s30   ;;  %s4923_s4 = sphi %s5068_s4, %s6246_s4  }
  0x1a   : > { %6198 = sst [smem:[#allocation13_spill]] %s4931_s24  ;;  %s5090_s1 = sadd.s32 1, %s4935_s25  }
  0x1b   : > { %6199 = sst [smem:[#allocation14_spill]] %s5090_s1  ;;  %s451_s26 = ssub.s32 %s4935_s25, %s5090_s1 }
  0x1c   : > { %s454_s2 = sadd.s32 1, %s4931_s24  ;;  %p452_p0 = scmp.eq.s32.totalorder %s451_s26, 0 }
  0x1d   : > { %p461_p1 = scmp.ne.s32.totalorder %s4931_s24, %s4927_s30  ;;  %p462_p2 = scmp.eq.s32.totalorder %s4935_s25, 0 }
  0x1e   : > { %p467_p3 = scmp.ne.s32.totalorder %s4927_s30, %s4923_s4  ;;  %p468_p5 = scmp.eq.s32.totalorder %s5087_s5, 0 }
  0x1f   : > { %s5100_s6 = scalar_select %p452_p0, %s4931_s24, %s454_s2  }
  0x20   : > { %p463_p4 = por %p462_p2, %p461_p1  ;;  %p4694_p6 = scmp.lt.s32.totalorder %s4935_s25, 2 }
  0x21   : > { %6200 = sst [smem:[#allocation15_spill]] %s5100_s6  ;;  %p5104_p7 = por %p468_p5, %p467_p3 }
  0x22   : > { %s5109_s7 = sand.u32 1, %s4931_s24   ;;  %s6174_s29 = sshll.u32 %s4935_s25, 12 }
  0x23   : > { %s6201_s27 = scalar_select %p5104_p7, 1, 0 }
  0x24   : > { %s6173_s28 = sshll.u32 %s5109_s7, 8  ;;  %s6202_s17 = sld [smem:[#allocation30_spill]] }
  0x25   : > { %s735_s26 = scalar_lea.vmem [#allocation3], %s6173_s28  ;;  %p5124_p8 = pnand %p4694_p6, %p463_p4 }
  0x26   : > { %s742_s2 = sshll.u32 %s735_s26, 4  ;;  %s5122_s2 = int_to_ptr.vmem [resolvable:$true] %s742_s2 }
  0x27   : > { %p4815_p11 = pneg %p5124_p8 }
  0x2a   : > { %s5118_s4 = scalar_lea.hbm %s6202_s17, %s6174_s29  ;;  %s4818_s26 = scalar_lea.hbm %s6202_s17, 8192 }
  0x2b   : > { %s4813_s1 = scalar_lea.hbm %s5118_s4, 4096  ;;  %p4819_p0 = scmp.lt.s32.totalorder %s5118_s4, %s6202_s17 }
  0x2c   : > { %p4814_p10 = scmp.ne.s32.totalorder %s5118_s4, %s4813_s1  ;;  %p4820_p1 = scmp.lt.s32.totalorder %s4818_s26, %s4813_s1 }
  0x2e   : > { %p4816_p12 = pnand %p4815_p11, %p4814_p10  ;;  %p4821_p2 = por %p4820_p1, %p4819_p0 }
  0x30   : > { %p4817_p13 = pneg %p4816_p12 }
  0x32   : > { %p4822_p3 = pnand %p4821_p2, %p4817_p13 }
  0x34   : > { %4825 = shalt.err (!%p4822_p3)
}
  0x35   : > { %s4826_s24 = scalar_lea.vmem %s5122_s2, 4096  ;;  %s4937_s3 = smov [#allocation3]  }
  0x36   : > { %p4827_p4 = scmp.ne.s32.totalorder %s5122_s2, %s4826_s24  ;;  %s4831_s0 = sshll.u32 %s4937_s3, 4  ;;  %s4832_s0 = int_to_ptr.vmem [resolvable:$false] %s4831_s0 }
  0x37   : > { %s4833_s23 = scalar_lea.vmem %s4832_s0, 8192  ;;  %p4834_p10 = scmp.lt.s32.totalorder %s5122_s2, %s4832_s0 }
  0x38   : > { %p4829_p5 = pnand %p4827_p4, %p4815_p11  ;;  %p4835_p12 = scmp.lt.s32.totalorder %s4833_s23, %s4826_s24 }
  0x3a   : > { %p4830_p6 = pneg %p4829_p5  ;;  %p4836_p9 = por %p4835_p12, %p4834_p10 }
  0x3c   : > { %p4837_p0 = pnand %p4836_p9, %p4830_p6 }
  0x3e   : > { %4840 = shalt.err (!%p4837_p0)
}
  0x3f   : > { %s4938_s1 = smov 1024   ;;  %s4939_s28 = smov 64  }
  0x40   : > { %s6204_s23 = scalar_lea.sflag [#allocation4], %s5109_s7  ;;  %p796_p9 = scmp.lt.s32.totalorder %s4935_s25, 3 }
  0x41   : > { %4690 = dma.hbm_to_vmem [thread:$0]  (!%p5124_p8), %s5118_s4, 4096, %s5122_s2, %s6204_s23, %s4938_s1, %s4938_s1, %s4939_s28  }
  0x42   : > { %s6205_s24 = sshll.u32 %s4935_s25, 12  ;;  %s6206_s19 = sld [smem:[#allocation32_spill]] }
  0x43   : > { %p6207_p13 = scmp.ge.s32.totalorder %s4935_s25, 1  ;;  %s6209_s17 = sshll.u32 %s5109_s7, 8 }
  0x44   : > { %s763_s22 = scalar_lea.vmem [#allocation6], %s6209_s17  ;;  %s760_s4 = scalar_lea.sflag [#allocation7], %s5109_s7 }
  0x45   : > { %p5169_p1 = pnand %p6207_p13, %p796_p9  ;;  %s770_s21 = sshll.u32 %s763_s22, 4  ;;  %s5175_s21 = int_to_ptr.vmem [resolvable:$true] %s770_s21 }
  0x48   : > { %s5165_s3 = scalar_lea.hbm %s6206_s19, %s6205_s24  ;;  %s4846_s24 = scalar_lea.hbm %s6206_s19, 8192 }
  0x49   : > { %s4841_s2 = scalar_lea.hbm %s5165_s3, 4096  ;;  %p4847_p5 = scmp.lt.s32.totalorder %s5165_s3, %s6206_s19 }
  0x4a   : > { %p4842_p2 = scmp.ne.s32.totalorder %s5165_s3, %s4841_s2  ;;  %p4848_p6 = scmp.lt.s32.totalorder %s4846_s24, %s4841_s2 }
  0x4c   : > { %p4844_p3 = pnand %p4842_p2, %p4815_p11  ;;  %p4849_p10 = por %p4848_p6, %p4847_p5 }
  0x4e   : > { %p4845_p4 = pneg %p4844_p3 }
  0x50   : > { %p4850_p12 = pnand %p4849_p10, %p4845_p4 }
  0x52   : > { %4853 = shalt.err (!%p4850_p12)
}
  0x53   : > { %s4854_s17 = scalar_lea.vmem %s5175_s21, 4096  ;;  %s4940_s22 = smov [#allocation6]  }
  0x54   : > { %p4855_p0 = scmp.ne.s32.totalorder %s5175_s21, %s4854_s17  ;;  %s4859_s7 = sshll.u32 %s4940_s22, 4  ;;  %s4860_s7 = int_to_ptr.vmem [resolvable:$false] %s4859_s7 }
  0x55   : > { %s4861_s25 = scalar_lea.vmem %s4860_s7, 8192  ;;  %p4862_p2 = scmp.lt.s32.totalorder %s5175_s21, %s4860_s7 }
  0x56   : > { %p4857_p9 = pnand %p4855_p0, %p4815_p11  ;;  %p4863_p3 = scmp.lt.s32.totalorder %s4861_s25, %s4854_s17 }
  0x58   : > { %p4858_p13 = pneg %p4857_p9  ;;  %p4864_p7 = por %p4863_p3, %p4862_p2 }
  0x5a   : > { %p4865_p5 = pnand %p4864_p7, %p4858_p13 }
  0x5c   : > { %4868 = shalt.err (!%p4865_p5)
}
  0x5d   : > { %4693 = dma.hbm_to_vmem [thread:$0]  (!%p5124_p8), %s5165_s3, 4096, %s5175_s21, %s760_s4, %s4938_s1, %s4938_s1, %s4939_s28  }
  0x5e   : > { %800 = sbr.rel (%p5169_p1) target bundleno = 2833 (0xb11), region = 112 }
  0x63   : > { %s802_s2 = sand.u32 1, %s4927_s30   ;;  %p6211_p7 = scmp.ne.s32.totalorder %s6201_s27, 0 }
  0x64   : > { %s4300_s23 = sshll.u32 %s802_s2, 8  ;;  %s803_s24 = scalar_lea.sflag [#allocation4], %s802_s2 }
  0x65   : > { %s5206_s29 = scalar_lea.vmem [#allocation3], %s4300_s23 }
  0x66   : > { %6210 = sst [smem:[#allocation16_spill]] %s5206_s29 }
  0x67   : > { %4910 = dma.done.wait (%p6211_p7), %s803_s24, 4096  }
  0x68   : > { %4912 = vsyncadd (%p6211_p7), %s803_s24, 4294963200  ;;  %s812_s6 = scalar_lea.sflag [#allocation7], %s802_s2  ;;  %s5212_s26 = scalar_lea.vmem [#allocation6], %s4300_s23 }
  0x69   : > { %6212 = sst [smem:[#allocation17_spill]] %s5212_s26 }
  0x6a   : > { %4914 = dma.done.wait (%p6211_p7), %s812_s6, 4096  }
  0x6b   : > { %4916 = vsyncadd (%p6211_p7), %s812_s6, 4294963200  ;;  %p929_p8 = scmp.lt.s32.totalorder %s5087_s5, 1  ;;  %s6213_s17 = sld [smem:[#allocation25_spill]] }
  0x6c   : > { %s6214_s8 = sld [smem:[#allocation26_spill]]  ;;  %p4311_p11 = scmp.ne.s32.totalorder %s5087_s5, 0 }
  0x6d   : > { %s5220_s21 = scalar_select %p929_p8, %s5087_s5, 1 }
  0x6e   : > { %s6215_s9 = sld [smem:[#allocation27_spill]] }
  0x6f   : > { %s4405_s1 = sshll.u32 %s5220_s21, 5  ;;  %s6216_s13 = sld [smem:[#allocation28_spill]] }
  0x70   : > { %s4310_s28 = sshll.u32 %s5220_s21, 4  ;;  %s6218_s18 = sld [smem:[#allocation31_spill]] }
  0x71   : > { %s5230_s22 = scalar_lea.vmem %s6213_s17, %s4405_s1  ;;  %s973_s17 = scalar_lea.vmem %s6160_s20, %s5220_s21 }
  0x72   : > { %s5235_s2 = scalar_lea.vmem %s6214_s8, %s4405_s1  ;;  %s6219_s8 = sld [smem:[#allocation33_spill]] }
  0x73   : > { %s6221_s3 = sld [smem:[#allocation18_spill]] (!%p4311_p11) }
  0x74   : > { %s5240_s6 = scalar_lea.vmem %s6215_s9, %s4405_s1  ;;  %s6220_s9 = sld [smem:[#allocation34_spill]] }
  0x75   : > { %s5253_s26 = scalar_lea.vmem %s6216_s13, %s4405_s1  ;;  %s6222_s30 = sld [smem:[#allocation21_spill]] (!%p4311_p11) }
  0x76   : > { %s5271_s0 = scalar_lea.vmem %s6218_s18, %s4310_s28  ;;  %983 = sbr.rel (%p4311_p11) target bundleno = 453 (0x1c5), region = 124 }
  0x77   : > { %s6224_s25 = sld [smem:[#allocation22_spill]] (!%p4311_p11) }
  0x78   : > { %s976_s13 = scalar_lea.vmem %s6219_s8, %s5220_s21 }
  0x7a   : > { %s979_s15 = scalar_lea.vmem %s6220_s9, %s5220_s21 }
  0x7b   : > { %v984_v0 = vld [vmem:[%s6221_s3] sm:$0xff]  ;;  %s6223_s18 = smov %s6222_s30  ;;  %v1001_v1 = vld [vmem:[%s6222_s30 + $0x8] sm:$0xff]  ;;  %v4941_v2 = vmov 0   ;;  %v986_v5 = vlaneseq  ;;  %vm1004_vm0 = vcmask 130048   ;;  %v4942_v8 = vmov 0.0  }
  0x7c   : > { %4738 = vset.pattern.permute.xlu0 %v4941_v2  ;;  %4509 = vmatprep.subr.mxu0 %v1001_v1  ;;  %v1000_v3 = vld [vmem:[%s6223_s18] sm:$0xff]  ;;  %v985_v4 = vld [vmem:[%s6221_s3 + $0x8] sm:$0xff]  ;;  %vm1086_vm3 = vcmask 261120  }
  0x7d   : > { %989 = vperm.xlu0 %4738, %v984_v0   ;;  %4510 = vmatpush3.msra.mxu0 %v1001_v1  ;;  %v987_v6 = vand.u32 127, %v986_v5  ;;  %s6225_s23 = smov %s6224_s25  ;;  %v1003_v12 = vld [vmem:[%s6224_s25 + $0x8] sm:$0xff] }
  0x7e   : > { %4511 = vmatprep.subr.mxu0 %v1000_v3  ;;  %v1002_v14 = vld [vmem:[%s6225_s23] sm:$0xff] }
  0x7f   : > { %4512 = vmatpush3.msra.mxu0 %v1000_v3 }
  0x81   : > { %992 = vperm.xlu0 %4738, %v985_v4  }
  0xf8   : > { %v990_v7 = vpop.permute.xlu0 %989 }
  0xf9   : > { %vm994_vm1 = vcmp.eq.s32.totalorder %v990_v7, %v987_v6 }
  0xfa   : > { %v4312_v9 = vsel %vm994_vm1, 1.0, %v4942_v8 }
  0xfb   : > { %4513 = vmatprep.mubr.msk.f32.mxu0 %vm1004_vm0, %v4312_v9 }
  0xfc   : > { %v993_v10 = vpop.permute.xlu0 %992 }
  0xfd   : > { %vm995_vm2 = vcmp.eq.s32.totalorder %v993_v10, %v987_v6 }
  0xfe   : > { %v4313_v11 = vsel %vm995_vm2, 1.0, %v4942_v8 }
  0xff   : > { %4514 = vmatmul.mubr.msk.f32.vlgmr.msra.gmra.mxu0 %vm1004_vm0, %v4313_v11 }
 0x1bf   : > { %v4515_v13 = vpop.f32.mrf.mxu0 }
 0x1c0   : > { %v1083_v15 = vadd.f32 %v4515_v13, %v1003_v12 }
 0x1c1   : > { %v1077_v16 = vpop.f32.mrf.mxu0 }
 0x1c2   : > { %1088 = vst.msk [vmem:[#allocation2 + $0x8] sm:$0xff] %vm1086_vm3, %v1083_v15  ;;  %v1078_v17 = vadd.f32 %v1077_v16, %v1002_v14 }
 0x1c4   : > { %1087 = vst.msk [vmem:[#allocation2] sm:$0xff] %vm1086_vm3, %v1078_v17 }
 0x1c5 PF: > { %v1166_v18 = vld [vmem:[%s5230_s22 + $0x18] sm:$0xff]  ;;  %v1165_v19 = vld [vmem:[%s5230_s22 + $0x10] sm:$0xff]  ;;  %vm1174_vm4 = vcmask 261120   ;;  %v1164_v21 = vld [vmem:[%s5230_s22 + $0x8] sm:$0xff]  ;;  %s6226_s28 = sld [smem:[#allocation24_spill]]  ;;  %vm1428_vm5 = vcmask 130048   ;;  %s6227_s1 = scalar_lea.vmem %s6150_s10, %s5220_s21 }
 0x1c6   : > { %4516 = vmatprep.subr.mxu0 %v1166_v18  ;;  %v1259_v22 = vld [vmem:[%s5235_s2 + $0x18] sm:$0xff]  ;;  %v1258_v23 = vld [vmem:[%s5235_s2 + $0x10] sm:$0xff]  ;;  %v1163_v24 = vld [vmem:[%s5230_s22] sm:$0xff]  ;;  %s6228_s4 = scalar_lea.vmem %s6151_s11, %s5220_s21  ;;  %s6229_s24 = scalar_lea.vmem %s6152_s12, %s5220_s21 }
 0x1c7   : > { %4517 = vmatpush3.msra.mxu0 %v1166_v18  ;;  %4527 = vmatprep.subr.mxu1 %v1259_v22  ;;  %v1257_v25 = vld [vmem:[%s5235_s2 + $0x8] sm:$0xff]  ;;  %v1256_v27 = vld [vmem:[%s5235_s2] sm:$0xff]  ;;  %v1345_v29 = vld [vmem:[%s5240_s6 + $0x18] sm:$0xff]  ;;  %s6230_s19 = sld [smem:[#allocation23_spill]]  ;;  %s6240_s27 = scalar_lea.vmem %s6156_s16, %s5220_s21 }
 0x1c8   : > { %4518 = vmatprep.subr.mxu0 %v1165_v19  ;;  %4528 = vmatpush3.msra.mxu1 %v1259_v22  ;;  %v1344_v30 = vld [vmem:[%s5240_s6 + $0x10] sm:$0xff]  ;;  %v1343_v31 = vld [vmem:[%s5240_s6 + $0x8] sm:$0xff]  ;;  %v1342_v32 = vld [vmem:[%s5240_s6] sm:$0xff]  ;;  %s6231_s6 = sld [smem:[#allocation19_spill]]  ;;  %s4945_s7 = smov [#allocation8]  }
 0x1c9   : > { %4519 = vmatpush3.msra.mxu0 %v1165_v19  ;;  %4529 = vmatprep.subr.mxu1 %v1258_v23  ;;  %v1090_v26 = vld [vmem:[#allocation2 + $0x8] sm:$0xff]  ;;  %v4316_v33 = vld [vmem:[%s6227_s1] ss:$0 sm:$0xff]  ;;  %s6232_s25 = sld [smem:[#allocation20_spill]]  ;;  %p4695_p1 = scmp.eq.s32.totalorder %s5087_s5, 1 }
 0x1ca   : > { %4520 = vmatprep.subr.mxu0 %v1164_v21  ;;  %4530 = vmatpush3.msra.mxu1 %v1258_v23  ;;  %v4319_v35 = vld [vmem:[%s6228_s4] ss:$0 sm:$0xff]  ;;  %s6237_s30 = sld [smem:[#allocation16_spill]] }
 0x1cb   : > { %v1089_v20 = vld [vmem:[#allocation2] sm:$0xff]  ;;  %4521 = vmatpush3.msra.mxu0 %v1164_v21  ;;  %4531 = vmatprep.subr.mxu1 %v1257_v25  ;;  %v5342_v41 = vld [vmem:[%s6226_s28 + $0x8] sm:$0xff]  ;;  %v5347_v43 = vld [vmem:[%s6226_s28 + $0x10] sm:$0xff]  ;;  %s6241_s1 = sld [smem:[#allocation17_spill]] }
 0x1cc   : > { %4524 = vmatprep.mubr.msk.f32.mxu0 %vm1174_vm4, %v1089_v20  ;;  %4522 = vmatprep.subr.mxu0 %v1163_v24  ;;  %v5320_v28 = vld [vmem:[%s6226_s28] sm:$0xff]  ;;  %v5359_v45 = vld [vmem:[%s6226_s28 + $0x18] sm:$0xff]  ;;  %v5374_v47 = vld [vmem:[%s6226_s28 + $0x28] sm:$0xff] }
 0x1cd   : > { %4523 = vmatpush3.msra.mxu0 %v1163_v24  ;;  %4532 = vmatpush3.msra.mxu1 %v1257_v25  ;;  %v5364_v46 = vld [vmem:[%s6226_s28 + $0x20] sm:$0xff]  ;;  %v5379_v48 = vld [vmem:[%s6226_s28 + $0x30] sm:$0xff]  ;;  %v5388_v49 = vld [vmem:[%s6226_s28 + $0x38] sm:$0xff] }
 0x1ce   : > { %4525 = vmatmul.mubr.msk.f32.vlgmr.msra.gmra.mxu0 %vm1174_vm4, %v1090_v26  ;;  %4533 = vmatprep.subr.mxu1 %v1256_v27  ;;  %v5393_v50 = vld [vmem:[%s6226_s28 + $0x40] sm:$0xff]  ;;  %v5402_v51 = vld [vmem:[%s6226_s28 + $0x48] sm:$0xff]  ;;  %v5407_v52 = vld [vmem:[%s6226_s28 + $0x50] sm:$0xff] }
 0x1cf   : > { %4534 = vmatpush3.msra.mxu1 %v1256_v27  ;;  %4535 = vmatprep.mubr.msk.f32.mxu1 %vm1174_vm4, %v1089_v20  ;;  %v5416_v53 = vld [vmem:[%s6226_s28 + $0x58] sm:$0xff]  ;;  %v5421_v54 = vld [vmem:[%s6226_s28 + $0x60] sm:$0xff]  ;;  %v5430_v55 = vld [vmem:[%s6226_s28 + $0x68] sm:$0xff]  ;;  %s6233_s29 = smov %s6232_s25 }
 0x1d0   : > { %4536 = vmatmul.mubr.msk.f32.vlgmr.msra.gmra.mxu1 %vm1174_vm4, %v1090_v26  ;;  %4546 = vmatprep.mubr.msk.f32.mxu0 %vm1174_vm4, %v1089_v20  ;;  %v5435_v56 = vld [vmem:[%s6226_s28 + $0x70] sm:$0xff]  ;;  %v5444_v57 = vld [vmem:[%s6226_s28 + $0x78] sm:$0xff]  ;;  %v4322_v58 = vld [vmem:[%s6229_s24] ss:$0 sm:$0xff] }
 0x1d1   : > { %4553 = vmatprep.mubr.msk.f32.mxu1 %vm1428_vm5, %v5320_v28  ;;  %4538 = vmatprep.subr.mxu0 %v1345_v29  ;;  %v5456_v0 = vld [vmem:[%s6230_s19] sm:$0xff]  ;;  %v5461_v1 = vld [vmem:[%s6230_s19 + $0x8] sm:$0xff]  ;;  %v5468_v6 = vld [vmem:[%s6230_s19 + $0x10] sm:$0xff] }
 0x1d2   : > { %4539 = vmatpush3.msra.mxu0 %v1345_v29  ;;  %v5473_v7 = vld [vmem:[%s6230_s19 + $0x18] sm:$0xff]  ;;  %v5481_v10 = vld [vmem:[%s6230_s19 + $0x28] sm:$0xff]  ;;  %v5487_v13 = vld [vmem:[%s6230_s19 + $0x20] sm:$0xff] }
 0x1d3   : > { %4540 = vmatprep.subr.mxu0 %v1344_v30  ;;  %v5496_v17 = vld [vmem:[%s6230_s19 + $0x38] sm:$0xff]  ;;  %v5501_v19 = vld [vmem:[%s6230_s19 + $0x30] sm:$0xff]  ;;  %v5510_v23 = vld [vmem:[%s6230_s19 + $0x48] sm:$0xff] }
 0x1d4   : > { %4541 = vmatpush3.msra.mxu0 %v1344_v30  ;;  %v5515_v25 = vld [vmem:[%s6230_s19 + $0x40] sm:$0xff]  ;;  %v5524_v30 = vld [vmem:[%s6230_s19 + $0x58] sm:$0xff] }
 0x1d5   : > { %4542 = vmatprep.subr.mxu0 %v1343_v31 }
 0x1d6   : > { %4543 = vmatpush3.msra.mxu0 %v1343_v31 }
 0x1d7   : > { %4544 = vmatprep.subr.mxu0 %v1342_v32 }
 0x1d8   : > { %4545 = vmatpush3.msra.mxu0 %v1342_v32  ;;  %v5529_v32 = vld [vmem:[%s6230_s19 + $0x50] sm:$0xff] }
 0x1d9   : > { %4547 = vmatmul.mubr.msk.f32.vlgmr.msra.gmra.mxu0 %vm1174_vm4, %v1090_v26 }
 0x28e   : > { %v4526_v34 = vpop.f32.mrf.mxu0 }
 0x28f   : > { %v1253_v36 = vadd.f32 %v4526_v34, %v4316_v33 }
 0x290   : > { %v1247_v37 = vpop.f32.mrf.mxu0  ;;  %v4537_v38 = vpop.f32.mrf.mxu1 }
 0x291   : > { %v1248_v39 = vadd.f32 %v4316_v33, %v1247_v37  ;;  %4549 = vmatprep.subr.mxu1 %v1253_v36  ;;  %v1339_v40 = vadd.f32 %v4537_v38, %v4319_v35  ;;  %v5543_v38 = vld [vmem:[%s6230_s19 + $0x60] sm:$0xff] }
 0x292   : > { %4550 = vmatpush3.msra.mxu1 %v1253_v36  ;;  %v1333_v42 = vpop.f32.mrf.mxu1  ;;  %v5538_v36 = vld [vmem:[%s6230_s19 + $0x68] sm:$0xff] }
 0x293   : > { %4551 = vmatprep.subr.mxu1 %v1248_v39  ;;  %4577 = vmatprep.subr.msk.mxu0 %vm1174_vm4, %v1339_v40  ;;  %v1334_v44 = vadd.f32 %v4319_v35, %v1333_v42 }
 0x294   : > { %4552 = vmatpush3.msra.mxu1 %v1248_v39  ;;  %4578 = vmatpush3.xpose.msk.msra.mxu0 %vm1174_vm4, %v1339_v40 }
 0x295   : > { %4554 = vmatmul.mubr.msk.f32.vlgmr.msra.gmra.mxu1 %vm1428_vm5, %v5342_v41  ;;  %4579 = vmatprep.subr.msk.mxu0 %vm1174_vm4, %v1334_v44 }
 0x296   : > { %4556 = vmatprep.mubr.msk.f32.mxu1 %vm1428_vm5, %v5347_v43 }
 0x298   : > { %4580 = vmatpush3.xpose.msk.msra.mxu0 %vm1174_vm4, %v1334_v44  ;;  %v5552_v44 = vld [vmem:[%s6230_s19 + $0x78] sm:$0xff] }
 0x299   : > { %4557 = vmatmul.mubr.msk.f32.gmra.mxu1 %vm1428_vm5, %v5359_v45  ;;  %v4548_v59 = vpop.f32.mrf.mxu0 }
 0x29a   : > { %4559 = vmatprep.mubr.msk.f32.mxu1 %vm1428_vm5, %v5364_v46  ;;  %v1425_v60 = vadd.f32 %v4548_v59, %v4322_v58  ;;  %v5557_v59 = vld [vmem:[%s6230_s19 + $0x70] sm:$0xff] }
 0x29b   : > { %v1419_v61 = vpop.f32.mrf.mxu0 }
 0x29c   : > { %v1420_v62 = vadd.f32 %v4322_v58, %v1419_v61  ;;  %4605 = vmatprep.subr.mxu1 %v1425_v60 }
 0x29d   : > { %4560 = vmatmul.mubr.msk.f32.gmra.mxu1 %vm1428_vm5, %v5374_v47 }
 0x29e   : > { %4562 = vmatprep.mubr.msk.f32.mxu1 %vm1428_vm5, %v5379_v48  ;;  %4606 = vmatpush3.msra.mxu1 %v1425_v60 }
 0x29f   : > { %4607 = vmatprep.subr.mxu1 %v1420_v62 }
 0x2a0   : > { %4608 = vmatpush3.msra.mxu1 %v1420_v62 }
 0x2a1   : > { %4563 = vmatmul.mubr.msk.f32.gmra.mxu1 %vm1428_vm5, %v5388_v49 }
 0x2a2   : > { %4565 = vmatprep.mubr.msk.f32.mxu1 %vm1428_vm5, %v5393_v50 }
 0x2a5   : > { %4566 = vmatmul.mubr.msk.f32.gmra.mxu1 %vm1428_vm5, %v5402_v51 }
 0x2a6   : > { %4568 = vmatprep.mubr.msk.f32.mxu1 %vm1428_vm5, %v5407_v52 }
 0x2a9   : > { %4569 = vmatmul.mubr.msk.f32.gmra.mxu1 %vm1428_vm5, %v5416_v53 }
 0x2aa   : > { %4571 = vmatprep.mubr.msk.f32.mxu1 %vm1428_vm5, %v5421_v54 }
 0x2ad   : > { %4572 = vmatmul.mubr.msk.f32.gmra.mxu1 %vm1428_vm5, %v5430_v55 }
 0x2ae   : > { %4574 = vmatprep.mubr.msk.f32.mxu1 %vm1428_vm5, %v5435_v56 }
 0x2b1   : > { %4575 = vmatmul.mubr.msk.f32.gmra.mxu1 %vm1428_vm5, %v5444_v57 }
 0x355   : > { %v4555_v63 = vpop.f32.mrf.mxu1 }
 0x356   : > { %v1623_v4 = vmul.f32 %v4555_v63, %v5461_v1  ;;  %v1110_v63 = vlaneseq }
 0x357   : > { %v1543_v2 = vpop.f32.mrf.mxu1 }
 0x358   : > { %v1622_v3 = vmul.f32 %v1543_v2, %v5456_v0  ;;  %v1091_v2 = vld [vmem:[%s6231_s6] sm:$0x1]  ;;  %s6236_s6 = scalar_lea.vmem %s6154_s14, %s5220_s21 }
 0x359   : > { %v4558_v5 = vpop.f32.mrf.mxu1  ;;  %vm1092_vm6 = vcmp.eq.s32.totalorder %v1091_v2, 1 }
 0x35a   : > { %4581 = vmatprep.mubr.msk.f32.mxu0 %vm1174_vm4, %v1622_v3  ;;  %v1625_v11 = vmul.f32 %v4558_v5, %v5473_v7  ;;  %v5568_v3 = vshrl.u32 %v1110_v63, 7  ;;  %v4943_v5 = vmov 0  }
 0x35b   : > { %v1553_v8 = vpop.f32.mrf.mxu1  ;;  %4582 = vmatmul.mubr.msk.f32.vlgmr.msra.gmra.mxu0 %vm1174_vm4, %v1623_v4 }
 0x35c   : > { %v1624_v9 = vmul.f32 %v1553_v8, %v5468_v6  ;;  %v5571_v4 = vsub.s32 0, %v5568_v3  ;;  %v1109_v8 = vsel %vm1092_vm6, 1, %v4943_v5 }
 0x35d   : > { %v4561_v12 = vpop.f32.mrf.mxu1 }
 0x35e   : > { %4584 = vmatprep.mubr.msk.f32.mxu0 %vm1174_vm4, %v1624_v9  ;;  %v1627_v14 = vmul.f32 %v4561_v12, %v5481_v10  ;;  %v1113_v9 = vrot.slane %v1109_v8, %v5571_v4  ;;  %v1094_v12 = vld [vmem:[%s6233_s29 + $0x8] sm:$0xff]  ;;  %v1100_v8 = vld [vmem:[%s6233_s29 + $0x38] sm:$0xff] }
 0x35f   : > { %v1563_v15 = vpop.f32.mrf.mxu1  ;;  %4585 = vmatmul.mubr.msk.f32.gmra.mxu0 %vm1174_vm4, %v1625_v11  ;;  %v1093_v11 = vld [vmem:[%s6232_s25] sm:$0xff]  ;;  %s6238_s25 = sld [smem:[#allocation29_spill]] }
 0x360   : > { %v1626_v16 = vmul.f32 %v1563_v15, %v5487_v13  ;;  %vm5580_vm7 = vcmp.eq.s32.totalorder %v1113_v9, 1 }
 0x361   : > { %v4564_v18 = vpop.f32.mrf.mxu1 }
 0x362   : > { %4587 = vmatprep.mubr.msk.f32.mxu0 %vm1174_vm4, %v1626_v16  ;;  %v1629_v20 = vmul.f32 %v4564_v18, %v5496_v17  ;;  %v1115_v16 = vsel %vm5580_vm7, -1e+30, %v1093_v11  ;;  %v1095_v18 = vld [vmem:[%s6233_s29 + $0x10] sm:$0xff] }
 0x363   : > { %v1573_v21 = vpop.f32.mrf.mxu1  ;;  %4588 = vmatmul.mubr.msk.f32.gmra.mxu0 %vm1174_vm4, %v1627_v14 }
 0x364   : > { %v1628_v22 = vmul.f32 %v1573_v21, %v5501_v19 }
 0x365   : > { %v4567_v24 = vpop.f32.mrf.mxu1  ;;  %s6239_s24 = scalar_lea.vmem %s6238_s25, %s5220_s21  ;;  %s4073_s25 = sshll.u32 %s4945_s7, 4  ;;  %s4074_s25 = int_to_ptr.vmem [resolvable:$true] %s4073_s25 }
 0x366   : > { %4590 = vmatprep.mubr.msk.f32.mxu0 %vm1174_vm4, %v1628_v22  ;;  %v1631_v26 = vmul.f32 %v4567_v24, %v5510_v23  ;;  %v1096_v24 = vld [vmem:[%s6233_s29 + $0x18] sm:$0xff]  ;;  %p4876_p12 = scmp.lt.s32.totalorder %s4074_s25, %s4074_s25 }
 0x367   : > { %v1583_v27 = vpop.f32.mrf.mxu1  ;;  %4591 = vmatmul.mubr.msk.f32.gmra.mxu0 %vm1174_vm4, %v1629_v20  ;;  %v1116_v20 = vsel %vm5580_vm7, -1e+30, %v1094_v12 }
 0x368   : > { %v1630_v29 = vmul.f32 %v1583_v27, %v5515_v25  ;;  %v1117_v27 = vsel %vm5580_vm7, -1e+30, %v1095_v18  ;;  %v1101_v18 = vld [vmem:[%s6233_s29 + $0x40] sm:$0xff] }
 0x369   : > { %v4570_v31 = vpop.f32.mrf.mxu1 }
 0x36a   : > { %4593 = vmatprep.mubr.msk.f32.mxu0 %vm1174_vm4, %v1630_v29  ;;  %v1633_v33 = vmul.f32 %v4570_v31, %v5524_v30 }
 0x36b   : > { %v1593_v34 = vpop.f32.mrf.mxu1  ;;  %4594 = vmatmul.mubr.msk.f32.gmra.mxu0 %vm1174_vm4, %v1631_v26 }
 0x36c   : > { %v1632_v35 = vmul.f32 %v1593_v34, %v5529_v32  ;;  %v1118_v34 = vsel %vm5580_vm7, -1e+30, %v1096_v24 }
 0x36d   : > { %v4573_v37 = vpop.f32.mrf.mxu1 }
 0x36e   : > { %4596 = vmatprep.mubr.msk.f32.mxu0 %vm1174_vm4, %v1632_v35  ;;  %v1635_v39 = vmul.f32 %v4573_v37, %v5538_v36 }
 0x36f   : > { %v1603_v40 = vpop.f32.mrf.mxu1  ;;  %4597 = vmatmul.mubr.msk.f32.gmra.mxu0 %vm1174_vm4, %v1633_v33  ;;  %v1097_v33 = vld [vmem:[%s6233_s29 + $0x20] sm:$0xff] }
 0x370   : > { %v1634_v42 = vmul.f32 %v1603_v40, %v5543_v38 }
 0x371   : > { %v4576_v58 = vpop.f32.mrf.mxu1 }
 0x372   : > { %4599 = vmatprep.mubr.msk.f32.mxu0 %vm1174_vm4, %v1634_v42  ;;  %v1637_v60 = vmul.f32 %v4576_v58, %v5552_v44  ;;  %v1119_v42 = vsel %vm5580_vm7, -1e+30, %v1097_v33 }
 0x373   : > { %v1613_v61 = vpop.f32.mrf.mxu1  ;;  %4600 = vmatmul.mubr.msk.f32.gmra.mxu0 %vm1174_vm4, %v1635_v39  ;;  %v1098_v39 = vld [vmem:[%s6233_s29 + $0x28] sm:$0xff] }
 0x374   : > { %v1636_v62 = vmul.f32 %v1613_v61, %v5557_v59  ;;  %v1120_v63 = vsel %vm5580_vm7, -1e+30, %v1098_v39  ;;  %v1103_v39 = vld [vmem:[%s6233_s29 + $0x50] sm:$0xff] }
 0x376   : > { %4602 = vmatprep.mubr.msk.f32.mxu0 %vm1174_vm4, %v1636_v62  ;;  %v1099_v62 = vld [vmem:[%s6233_s29 + $0x30] sm:$0xff] }
 0x377   : > { %4603 = vmatmul.mubr.msk.f32.gmra.mxu0 %vm1174_vm4, %v1637_v60  ;;  %v1121_v11 = vsel %vm5580_vm7, -1e+30, %v1099_v62 }
 0x41b   : > { %v4583_v15 = vpop.f32.mrf.mxu0 }
 0x41c   : > { %v5598_v29 = vadd.f32 %v4583_v15, %v1116_v20  ;;  %v1122_v20 = vsel %vm5580_vm7, -1e+30, %v1100_v8 }
 0x41d   : > { %v1758_v21 = vpop.f32.mrf.mxu0 }
 0x41e   : > { %v5591_v22 = vadd.f32 %v1758_v21, %v1115_v16  ;;  %v1840_v60 = vsel %vm1428_vm5, %v5598_v29, -inf }
 0x41f   : > { %v4586_v26 = vpop.f32.mrf.mxu0 }
 0x420   : > { %v1837_v31 = vsel %vm1428_vm5, %v5591_v22, -inf  ;;  %v5614_v58 = vadd.f32 %v4586_v26, %v1118_v34  ;;  %v1102_v26 = vld [vmem:[%s6233_s29 + $0x48] sm:$0xff] }
 0x421   : > { %1838 = vmax.xlane.f32.xlu0 %v1837_v31  ;;  %v1768_v35 = vpop.f32.mrf.mxu0  ;;  %v1123_v31 = vsel %vm5580_vm7, -1e+30, %v1101_v18 }
 0x422   : > { %v5607_v37 = vadd.f32 %v1768_v35, %v1117_v27  ;;  %v1846_v15 = vsel %vm1428_vm5, %v5614_v58, -inf }
 0x423   : > { %v4589_v40 = vpop.f32.mrf.mxu0 }
 0x424   : > { %v1843_v61 = vsel %vm1428_vm5, %v5607_v37, -inf  ;;  %v5632_v12 = vadd.f32 %v4589_v40, %v1120_v63  ;;  %v1124_v40 = vsel %vm5580_vm7, -1e+30, %v1102_v26  ;;  %v1125_v63 = vsel %vm5580_vm7, -1e+30, %v1103_v39 }
 0x425   : > { %1841 = vmax.xlane.f32.xlu0 %v1840_v60  ;;  %1844 = vmax.xlane.f32.xlu1 %v1843_v61  ;;  %v1778_v2 = vpop.f32.mrf.mxu0  ;;  %v1104_v61 = vld [vmem:[%s6233_s29 + $0x58] sm:$0xff] }
 0x426   : > { %v5625_v5 = vadd.f32 %v1778_v2, %v1119_v42  ;;  %v1852_v34 = vsel %vm1428_vm5, %v5632_v12, -inf }
 0x427   : > { %v4592_v9 = vpop.f32.mrf.mxu0 }
 0x428   : > { %v1849_v16 = vsel %vm1428_vm5, %v5625_v5, -inf  ;;  %v5650_v33 = vadd.f32 %v4592_v9, %v1122_v20  ;;  %v1106_v20 = vld [vmem:[%s6233_s29 + $0x68] sm:$0xff] }
 0x429   : > { %1847 = vmax.xlane.f32.xlu1 %v1846_v15  ;;  %1850 = vmax.xlane.f32.xlu0 %v1849_v16  ;;  %v1788_v21 = vpop.f32.mrf.mxu0  ;;  %v1126_v15 = vsel %vm5580_vm7, -1e+30, %v1104_v61  ;;  %v1128_v39 = vsel %vm5580_vm7, -1e+30, %v1106_v20  ;;  %v1108_v61 = vld [vmem:[%s6233_s29 + $0x78] sm:$0xff] }
 0x42a   : > { %v5643_v24 = vadd.f32 %v1788_v21, %v1121_v11  ;;  %v1858_v8 = vsel %vm1428_vm5, %v5650_v33, -inf  ;;  %v1105_v11 = vld [vmem:[%s6233_s29 + $0x60] sm:$0xff] }
 0x42b   : > { %v4595_v27 = vpop.f32.mrf.mxu0  ;;  %v1127_v26 = vsel %vm5580_vm7, -1e+30, %v1105_v11 }
 0x42c   : > { %v1855_v35 = vsel %vm1428_vm5, %v5643_v24, -inf  ;;  %v5668_v2 = vadd.f32 %v4595_v27, %v1124_v40 }
 0x42d   : > { %1853 = vmax.xlane.f32.xlu1 %v1852_v34  ;;  %1856 = vmax.xlane.f32.xlu0 %v1855_v35  ;;  %v1798_v42 = vpop.f32.mrf.mxu0  ;;  %v1107_v35 = vld [vmem:[%s6233_s29 + $0x70] sm:$0xff] }
 0x42e   : > { %v5661_v60 = vadd.f32 %v1798_v42, %v1123_v31  ;;  %v1864_v31 = vsel %vm1428_vm5, %v5668_v2, -inf }
 0x42f   : > { %v4598_v62 = vpop.f32.mrf.mxu0 }
 0x430   : > { %v1861_v9 = vsel %vm1428_vm5, %v5661_v60, -inf  ;;  %v5686_v27 = vadd.f32 %v4598_v62, %v1126_v15  ;;  %v1130_v15 = vsel %vm5580_vm7, -1e+30, %v1108_v61 }
 0x431   : > { %1859 = vmax.xlane.f32.xlu1 %v1858_v8  ;;  %1862 = vmax.xlane.f32.xlu0 %v1861_v9  ;;  %v1808_v16 = vpop.f32.mrf.mxu0 }
 0x432   : > { %v5679_v18 = vadd.f32 %v1808_v16, %v1125_v63  ;;  %v1129_v63 = vsel %vm5580_vm7, -1e+30, %v1107_v35  ;;  %v1870_v9 = vsel %vm1428_vm5, %v5686_v27, -inf }
 0x433   : > { %v4601_v21 = vpop.f32.mrf.mxu0 }
 0x434   : > { %v1867_v34 = vsel %vm1428_vm5, %v5679_v18, -inf  ;;  %v5704_v8 = vadd.f32 %v4601_v21, %v1128_v39 }
 0x435   : > { %1865 = vmax.xlane.f32.xlu1 %v1864_v31  ;;  %1868 = vmax.xlane.f32.xlu0 %v1867_v34  ;;  %v1818_v40 = vpop.f32.mrf.mxu0 }
 0x436   : > { %v5697_v42 = vadd.f32 %v1818_v40, %v1127_v26  ;;  %v1876_v21 = vsel %vm1428_vm5, %v5704_v8, -inf }
 0x437   : > { %v4604_v62 = vpop.f32.mrf.mxu0 }
 0x438   : > { %v1873_v11 = vsel %vm1428_vm5, %v5697_v42, -inf  ;;  %v5714_v26 = vadd.f32 %v4604_v62, %v1130_v15 }
 0x439   : > { %1871 = vmax.xlane.f32.xlu1 %v1870_v9  ;;  %1874 = vmax.xlane.f32.xlu0 %v1873_v11  ;;  %v1828_v16 = vpop.f32.mrf.mxu0 }
 0x43a   : > { %v5712_v20 = vadd.f32 %v1828_v16, %v1129_v63  ;;  %v1882_v34 = vsel %vm1428_vm5, %v5714_v26, -inf }
 0x43c   : > { %v1879_v31 = vsel %vm1428_vm5, %v5712_v20, -inf }
 0x43d   : > { %1877 = vmax.xlane.f32.xlu1 %v1876_v21  ;;  %1880 = vmax.xlane.f32.xlu0 %v1879_v31 }
 0x441   : > { %1883 = vmax.xlane.f32.xlu1 %v1882_v34 }
 0x4aa   : > { %v1839_v14 = vpop.xlane.xlu0 %1838 }
 0x4ab   : > { %v1885_v35 = vsub.f32 %v5591_v22, %v1839_v14 }
 0x4ad   : > { %v1901_v39 = vmul.f32 1.442695, %v1885_v35 }
 0x4ae   : > { %v1842_v40 = vpop.xlane.xlu0 %1841  ;;  %v1845_v61 = vpop.xlane.xlu1 %1844 }
 0x4af   : > { %4739 = vpow2.f32 %v1901_v39  ;;  %v1886_v62 = vsub.f32 %v5598_v29, %v1842_v40  ;;  %v1887_v63 = vsub.f32 %v5607_v37, %v1845_v61 }
 0x4b1   : > { %v1903_v9 = vmul.f32 1.442695, %v1886_v62  ;;  %v1905_v11 = vmul.f32 1.442695, %v1887_v63 }
 0x4b2   : > { %v1848_v15 = vpop.xlane.xlu1 %1847  ;;  %v1851_v16 = vpop.xlane.xlu0 %1850 }
 0x4b3   : > { %4741 = vpow2.f32 %v1903_v9  ;;  %v1888_v21 = vsub.f32 %v5614_v58, %v1848_v15  ;;  %v1889_v31 = vsub.f32 %v5625_v5, %v1851_v16 }
 0x4b4   : > { %4743 = vpow2.f32 %v1905_v11 }
 0x4b5   : > { %v1907_v34 = vmul.f32 1.442695, %v1888_v21  ;;  %v1909_v22 = vmul.f32 1.442695, %v1889_v31 }
 0x4b6   : > { %v1854_v14 = vpop.xlane.xlu1 %1853  ;;  %v1857_v35 = vpop.xlane.xlu0 %1856 }
 0x4b7   : > { %4745 = vpow2.f32 %v1907_v34  ;;  %v1890_v39 = vsub.f32 %v5632_v12, %v1854_v14  ;;  %v1891_v29 = vsub.f32 %v5643_v24, %v1857_v35 }
 0x4b8   : > { %4747 = vpow2.f32 %v1909_v22 }
 0x4b9   : > { %v1911_v37 = vmul.f32 1.442695, %v1890_v39  ;;  %v1913_v40 = vmul.f32 1.442695, %v1891_v29 }
 0x4ba   : > { %v1860_v61 = vpop.xlane.xlu1 %1859  ;;  %v1863_v62 = vpop.xlane.xlu0 %1862 }
 0x4bb   : > { %4749 = vpow2.f32 %v1911_v37  ;;  %v1892_v58 = vsub.f32 %v5650_v33, %v1860_v61  ;;  %v1893_v5 = vsub.f32 %v5661_v60, %v1863_v62 }
 0x4bc   : > { %v5731_v63 = vpop.eup %4739  ;;  %4751 = vpow2.f32 %v1913_v40 }
 0x4bd   : > { %v1915_v9 = vmul.f32 1.442695, %v1892_v58  ;;  %v1917_v11 = vmul.f32 1.442695, %v1893_v5  ;;  %v1933_v12 = vsel %vm1428_vm5, %v5731_v63, 0.0 }
 0x4be   : > { %v1866_v15 = vpop.xlane.xlu1 %1865  ;;  %v1869_v24 = vpop.xlane.xlu0 %1868  ;;  %1934 = vadd.xlane.f32.xlu0 %v1933_v12 }
 0x4bf   : > { %4753 = vpow2.f32 %v1915_v9  ;;  %v1894_v16 = vsub.f32 %v5668_v2, %v1866_v15  ;;  %v1895_v21 = vsub.f32 %v5679_v18, %v1869_v24 }
 0x4c0   : > { %v5737_v31 = vpop.eup %4741  ;;  %4755 = vpow2.f32 %v1917_v11 }
 0x4c1   : > { %v5739_v33 = vpop.eup %4743  ;;  %v1919_v60 = vmul.f32 1.442695, %v1894_v16  ;;  %v1921_v34 = vmul.f32 1.442695, %v1895_v21  ;;  %v1936_v22 = vsel %vm1428_vm5, %v5737_v31, 0.0 }
 0x4c2   : > { %v1872_v14 = vpop.xlane.xlu1 %1871  ;;  %v1875_v35 = vpop.xlane.xlu0 %1874  ;;  %1937 = vadd.xlane.f32.xlu1 %v1936_v22  ;;  %v1939_v39 = vsel %vm1428_vm5, %v5739_v33, 0.0 }
 0x4c3   : > { %4757 = vpow2.f32 %v1919_v60  ;;  %v1896_v2 = vsub.f32 %v5686_v27, %v1872_v14  ;;  %v1897_v18 = vsub.f32 %v5697_v42, %v1875_v35  ;;  %1940 = vadd.xlane.f32.xlu0 %v1939_v39 }
 0x4c4   : > { %v5747_v29 = vpop.eup %4745  ;;  %4759 = vpow2.f32 %v1921_v34 }
 0x4c5   : > { %v5749_v37 = vpop.eup %4747  ;;  %v1923_v40 = vmul.f32 1.442695, %v1896_v2  ;;  %v1925_v61 = vmul.f32 1.442695, %v1897_v18  ;;  %v1942_v62 = vsel %vm1428_vm5, %v5747_v29, 0.0 }
 0x4c6   : > { %v1878_v58 = vpop.xlane.xlu1 %1877  ;;  %1943 = vadd.xlane.f32.xlu1 %v1942_v62  ;;  %v1945_v5 = vsel %vm1428_vm5, %v5749_v37, 0.0  ;;  %v1881_v9 = vpop.xlane.xlu0 %1880 }
 0x4c7   : > { %4761 = vpow2.f32 %v1923_v40  ;;  %v1898_v27 = vsub.f32 %v5704_v8, %v1878_v58  ;;  %1946 = vadd.xlane.f32.xlu0 %v1945_v5  ;;  %v1899_v42 = vsub.f32 %v5712_v20, %v1881_v9 }
 0x4c8   : > { %v5757_v11 = vpop.eup %4749  ;;  %4763 = vpow2.f32 %v1925_v61 }
 0x4c9   : > { %v5759_v12 = vpop.eup %4751  ;;  %v1927_v15 = vmul.f32 1.442695, %v1898_v27  ;;  %v1929_v24 = vmul.f32 1.442695, %v1899_v42  ;;  %v1948_v16 = vsel %vm1428_vm5, %v5757_v11, 0.0 }
 0x4ca   : > { %1949 = vadd.xlane.f32.xlu1 %v1948_v16  ;;  %v1884_v21 = vpop.xlane.xlu1 %1883  ;;  %v1951_v60 = vsel %vm1428_vm5, %v5759_v12, 0.0 }
 0x4cb   : > { %4765 = vpow2.f32 %v1927_v15  ;;  %v1900_v8 = vsub.f32 %v5714_v26, %v1884_v21  ;;  %1952 = vadd.xlane.f32.xlu0 %v1951_v60 }
 0x4cc   : > { %v5766_v20 = vpop.eup %4753  ;;  %4767 = vpow2.f32 %v1929_v24 }
 0x4cd   : > { %v5768_v34 = vpop.eup %4755  ;;  %v1931_v22 = vmul.f32 1.442695, %v1900_v8  ;;  %v1954_v14 = vsel %vm1428_vm5, %v5766_v20, 0.0 }
 0x4ce   : > { %1955 = vadd.xlane.f32.xlu1 %v1954_v14  ;;  %v1957_v35 = vsel %vm1428_vm5, %v5768_v34, 0.0 }
 0x4cf   : > { %4769 = vpow2.f32 %v1931_v22  ;;  %1958 = vadd.xlane.f32.xlu0 %v1957_v35 }
 0x4d0   : > { %v5774_v39 = vpop.eup %4757 }
 0x4d1   : > { %v5776_v2 = vpop.eup %4759  ;;  %v1960_v26 = vsel %vm1428_vm5, %v5774_v39, 0.0 }
 0x4d2   : > { %1961 = vadd.xlane.f32.xlu1 %v1960_v26  ;;  %v1963_v18 = vsel %vm1428_vm5, %v5776_v2, 0.0 }
 0x4d3   : > { %1964 = vadd.xlane.f32.xlu0 %v1963_v18 }
 0x4d4   : > { %v5782_v40 = vpop.eup %4761 }
 0x4d5   : > { %v5784_v61 = vpop.eup %4763  ;;  %v1966_v62 = vsel %vm1428_vm5, %v5782_v40, 0.0 }
 0x4d6   : > { %1967 = vadd.xlane.f32.xlu1 %v1966_v62  ;;  %v1969_v58 = vsel %vm1428_vm5, %v5784_v61, 0.0 }
 0x4d7   : > { %1970 = vadd.xlane.f32.xlu0 %v1969_v58 }
 0x4d8   : > { %v5790_v5 = vpop.eup %4765 }
 0x4d9   : > { %v5792_v9 = vpop.eup %4767  ;;  %v1972_v27 = vsel %vm1428_vm5, %v5790_v5, 0.0 }
 0x4da   : > { %1973 = vadd.xlane.f32.xlu1 %v1972_v27  ;;  %v1975_v42 = vsel %vm1428_vm5, %v5792_v9, 0.0 }
 0x4db   : > { %1976 = vadd.xlane.f32.xlu0 %v1975_v42 }
 0x4dc   : > { %v5798_v15 = vpop.eup %4769 }
 0x4dd   : > { %v1978_v24 = vsel %vm1428_vm5, %v5798_v15, 0.0 }
 0x4de   : > { %1979 = vadd.xlane.f32.xlu1 %v1978_v24 }
 0x508   : > { %2222 = vxpose.xlu0.b32.start [1/16] (narrow) %v5320_v28, 16 }
 0x50c   : > { %2223 = vxpose.xlu0.b32.cont [2/16] (narrow) %v5342_v41, 16 }
 0x510   : > { %2224 = vxpose.xlu0.b32.cont [3/16] (narrow) %v5347_v43, 16 }
 0x514   : > { %2225 = vxpose.xlu0.b32.cont [4/16] (narrow) %v5359_v45, 16 }
 0x518   : > { %2226 = vxpose.xlu0.b32.cont [5/16] (narrow) %v5364_v46, 16 }
 0x51c   : > { %2227 = vxpose.xlu0.b32.cont [6/16] (narrow) %v5374_v47, 16 }
 0x520   : > { %2228 = vxpose.xlu0.b32.cont [7/16] (narrow) %v5379_v48, 16 }
 0x524   : > { %2229 = vxpose.xlu0.b32.cont [8/16] (narrow) %v5388_v49, 16 }
 0x528   : > { %2230 = vxpose.xlu0.b32.cont [9/16] (narrow) %v5393_v50, 16 }
 0x52c   : > { %2231 = vxpose.xlu0.b32.cont [10/16] (narrow) %v5402_v51, 16 }
 0x530   : > { %2232 = vxpose.xlu0.b32.cont [11/16] (narrow) %v5407_v52, 16 }
 0x534   : > { %2233 = vxpose.xlu0.b32.cont [12/16] (narrow) %v5416_v53, 16 }
 0x538   : > { %2234 = vxpose.xlu0.b32.cont [13/16] (narrow) %v5421_v54, 16 }
 0x53c   : > { %2235 = vxpose.xlu0.b32.cont [14/16] (narrow) %v5430_v55, 16 }
 0x540   : > { %2236 = vxpose.xlu0.b32.cont [15/16] (narrow) %v5435_v56, 16 }
 0x544   : > { %2237 = vxpose.xlu0.b32.end [16/16] (narrow) %v5444_v57, 16 }
 0x547   : > { %v1935_v28 = vpop.xlane.xlu0 %1934 }
 0x548   : > { %4771 = vrcp.f32 %v1935_v28 }
 0x54b   : > { %v1938_v41 = vpop.xlane.xlu1 %1937 }
 0x54c   : > { %4773 = vrcp.f32 %v1938_v41  ;;  %v1941_v43 = vpop.xlane.xlu0 %1940 }
 0x54d   : > { %4775 = vrcp.f32 %v1941_v43 }
 0x54f   : > { %v1944_v45 = vpop.xlane.xlu1 %1943 }
 0x550   : > { %4777 = vrcp.f32 %v1944_v45  ;;  %v1947_v46 = vpop.xlane.xlu0 %1946 }
 0x551   : > { %4779 = vrcp.f32 %v1947_v46 }
 0x553   : > { %v1950_v47 = vpop.xlane.xlu1 %1949 }
 0x554   : > { %4781 = vrcp.f32 %v1950_v47  ;;  %v1953_v48 = vpop.xlane.xlu0 %1952 }
 0x555   : > { %v4772_v49 = vpop.eup %4771  ;;  %4783 = vrcp.f32 %v1953_v48 }
 0x556   : > { %v1982_v50 = vmul.f32 %v4772_v49, %v5731_v63 }
 0x557   : > { %v1956_v51 = vpop.xlane.xlu1 %1955 }
 0x558   : > { %4785 = vrcp.f32 %v1956_v51  ;;  %v1959_v52 = vpop.xlane.xlu0 %1958  ;;  %4609 = vmatprep.mubr.msk.f32.mxu1 %vm1428_vm5, %v1982_v50 }
 0x559   : > { %v4774_v53 = vpop.eup %4773  ;;  %4787 = vrcp.f32 %v1959_v52 }
 0x55a   : > { %v4776_v54 = vpop.eup %4775  ;;  %v1984_v55 = vmul.f32 %v4774_v53, %v5737_v31 }
 0x55b   : > { %v1962_v56 = vpop.xlane.xlu1 %1961  ;;  %v1986_v57 = vmul.f32 %v4776_v54, %v5739_v33 }
 0x55c   : > { %4789 = vrcp.f32 %v1962_v56  ;;  %v1965_v16 = vpop.xlane.xlu0 %1964  ;;  %4610 = vmatmul.mubr.msk.f32.vlgmr.msra.gmra.mxu1 %vm1428_vm5, %v1984_v55 }
 0x55d   : > { %v4778_v21 = vpop.eup %4777  ;;  %4791 = vrcp.f32 %v1965_v16  ;;  %4612 = vmatprep.mubr.msk.f32.mxu1 %vm1428_vm5, %v1986_v57 }
 0x55e   : > { %v4780_v63 = vpop.eup %4779  ;;  %v1988_v60 = vmul.f32 %v4778_v21, %v5747_v29 }
 0x55f   : > { %v1968_v8 = vpop.xlane.xlu1 %1967  ;;  %v1990_v22 = vmul.f32 %v4780_v63, %v5749_v37 }
 0x560   : > { %4793 = vrcp.f32 %v1968_v8  ;;  %v1971_v14 = vpop.xlane.xlu0 %1970  ;;  %4613 = vmatmul.mubr.msk.f32.gmra.mxu1 %vm1428_vm5, %v1988_v60 }
 0x561   : > { %v4782_v31 = vpop.eup %4781  ;;  %4795 = vrcp.f32 %v1971_v14  ;;  %4615 = vmatprep.mubr.msk.f32.mxu1 %vm1428_vm5, %v1990_v22 }
 0x562   : > { %v4784_v33 = vpop.eup %4783  ;;  %v1992_v35 = vmul.f32 %v4782_v31, %v5757_v11 }
 0x563   : > { %v1974_v26 = vpop.xlane.xlu1 %1973  ;;  %v1994_v18 = vmul.f32 %v4784_v33, %v5759_v12 }
 0x564   : > { %4797 = vrcp.f32 %v1974_v26  ;;  %v1977_v62 = vpop.xlane.xlu0 %1976  ;;  %4616 = vmatmul.mubr.msk.f32.gmra.mxu1 %vm1428_vm5, %v1992_v35 }
 0x565   : > { %v4786_v29 = vpop.eup %4785  ;;  %4799 = vrcp.f32 %v1977_v62  ;;  %4618 = vmatprep.mubr.msk.f32.mxu1 %vm1428_vm5, %v1994_v18  ;;  %v4375_v18 = vld [vmem:[%s6236_s6] ss:$0 sm:$0xff] }
 0x566   : > { %v4788_v37 = vpop.eup %4787  ;;  %v1996_v58 = vmul.f32 %v4786_v29, %v5766_v20 }
 0x567   : > { %v1980_v27 = vpop.xlane.xlu1 %1979  ;;  %v1998_v42 = vmul.f32 %v4788_v37, %v5768_v34  ;;  %v4811_v37 = vld [vmem:[#allocation2] sm:$0xff] }
 0x568   : > { %4801 = vrcp.f32 %v1980_v27  ;;  %4619 = vmatmul.mubr.msk.f32.gmra.mxu1 %vm1428_vm5, %v1996_v58 }
 0x569   : > { %v4790_v11 = vpop.eup %4789  ;;  %4621 = vmatprep.mubr.msk.f32.mxu1 %vm1428_vm5, %v1998_v42 }
 0x56a   : > { %v4792_v12 = vpop.eup %4791  ;;  %v2000_v24 = vmul.f32 %v4790_v11, %v5774_v39 }
 0x56b   : > { %v2002_v28 = vmul.f32 %v4792_v12, %v5776_v2  ;;  %v4812_v12 = vld [vmem:[#allocation2 + $0x8] sm:$0xff] }
 0x56c   : > { %4622 = vmatmul.mubr.msk.f32.gmra.mxu1 %vm1428_vm5, %v2000_v24 }
 0x56d   : > { %v4794_v41 = vpop.eup %4793  ;;  %4624 = vmatprep.mubr.msk.f32.mxu1 %vm1428_vm5, %v2002_v28 }
 0x56e   : > { %v4796_v20 = vpop.eup %4795  ;;  %v2004_v43 = vmul.f32 %v4794_v41, %v5782_v40 }
 0x56f   : > { %v2006_v34 = vmul.f32 %v4796_v20, %v5784_v61 }
 0x570   : > { %4625 = vmatmul.mubr.msk.f32.gmra.mxu1 %vm1428_vm5, %v2004_v43 }
 0x571   : > { %v4798_v45 = vpop.eup %4797  ;;  %4627 = vmatprep.mubr.msk.f32.mxu1 %vm1428_vm5, %v2006_v34  ;;  %v2499_v34 = vld [vmem:[%s6237_s30 + $0xc8] sm:$0xff] }
 0x572   : > { %v4800_v46 = vpop.eup %4799  ;;  %v2008_v39 = vmul.f32 %v4798_v45, %v5790_v5  ;;  %v2556_v45 = vunpack.c.l.bf16 %v2499_v34 }
 0x573   : > { %v2010_v2 = vmul.f32 %v4800_v46, %v5792_v9  ;;  %v2557_v46 = vunpack.c.h.bf16 %v2499_v34 }
 0x574   : > { %4628 = vmatmul.mubr.msk.f32.gmra.mxu1 %vm1428_vm5, %v2008_v39  ;;  %v2498_v39 = vld [vmem:[%s6237_s30 + $0xc0] sm:$0xff] }
 0x575   : > { %v4802_v47 = vpop.eup %4801  ;;  %4630 = vmatprep.mubr.msk.f32.mxu1 %vm1428_vm5, %v2010_v2  ;;  %2857 = vmatprep.subr.mxu1 %v2557_v46  ;;  %v2555_v2 = vunpack.c.h.bf16 %v2498_v39  ;;  %v2476_v46 = vld [vmem:[%s6237_s30 + $0x10] sm:$0xff] }
 0x576   : > { %v2012_v48 = vmul.f32 %v4802_v47, %v5798_v15  ;;  %2858 = vmatpush1.msra.mxu1 %v2556_v45  ;;  %v2491_v47 = vld [vmem:[%s6237_s30 + $0x88] sm:$0xff] }
 0x578   : > { %4631 = vmatmul.mubr.msk.f32.gmra.mxu1 %vm1428_vm5, %v2012_v48  ;;  %v2554_v48 = vunpack.c.l.bf16 %v2498_v39  ;;  %v2477_v39 = vld [vmem:[%s6237_s30 + $0x18] sm:$0xff] }
 0x584   : > { %v2238_v40 = vpop.trf.xlu0 }
 0x585   : > { %4665 = vmatprep.mubr.f32.mxu0 %v2238_v40  ;;  %v2490_v40 = vld [vmem:[%s6237_s30 + $0x80] sm:$0xff] }
 0x61c   : > { %v4611_v61 = vpop.f32.mrf.mxu1 }
 0x61e   : > { %v2127_v49 = vpop.f32.mrf.mxu1 }
 0x620   : > { %v4614_v50 = vpop.f32.mrf.mxu1 }
 0x622   : > { %v2137_v51 = vpop.f32.mrf.mxu1 }
 0x624   : > { %v4617_v52 = vpop.f32.mrf.mxu1 }
 0x626   : > { %v2147_v53 = vpop.f32.mrf.mxu1 }
 0x628   : > { %v4620_v5 = vpop.f32.mrf.mxu1 }
 0x62a   : > { %v2157_v54 = vpop.f32.mrf.mxu1 }
 0x62c   : > { %v4623_v9 = vpop.f32.mrf.mxu1 }
 0x62e   : > { %v2167_v55 = vpop.f32.mrf.mxu1 }
 0x630   : > { %v4626_v56 = vpop.f32.mrf.mxu1 }
 0x631   : > { %v2217_v31 = vmul.f32 %v4626_v56, %v5524_v30  ;;  %v2212_v30 = vmul.f32 %v2157_v54, %v5501_v19  ;;  %v2207_v19 = vmul.f32 %v4611_v61, %v5461_v1  ;;  %v2330_v1 = vld [vmem:[%s5253_s26 + $0x8] sm:$0xff]  ;;  %v2541_v61 = vunpack.c.h.bf16 %v2491_v47 }
 0x632   : > { %v2177_v57 = vpop.f32.mrf.mxu1 }
 0x633   : > { %v2216_v33 = vmul.f32 %v2177_v57, %v5529_v32  ;;  %v2211_v32 = vmul.f32 %v4617_v52, %v5481_v10  ;;  %v2206_v10 = vmul.f32 %v2127_v49, %v5456_v0  ;;  %v2539_v49 = vunpack.c.h.bf16 %v2490_v40  ;;  %2859 = vmatprep.subr.mxu1 %v2541_v61  ;;  %v2474_v57 = vld [vmem:[%s6237_s30] sm:$0xff] }
 0x634   : > { %v4629_v16 = vpop.f32.mrf.mxu1  ;;  %v2538_v52 = vunpack.c.l.bf16 %v2490_v40 }
 0x635   : > { %v2219_v22 = vmul.f32 %v4629_v16, %v5538_v36  ;;  %v2214_v36 = vmul.f32 %v2167_v55, %v5515_v25  ;;  %v2209_v25 = vmul.f32 %v4614_v50, %v5473_v7  ;;  %v2331_v7 = vld [vmem:[%s5253_s26 + $0x10] sm:$0xff]  ;;  %v2540_v50 = vunpack.c.l.bf16 %v2491_v47  ;;  %v2475_v55 = vld [vmem:[%s6237_s30 + $0x8] sm:$0xff] }
 0x636   : > { %v2187_v21 = vpop.f32.mrf.mxu1  ;;  %v2509_v16 = vunpack.c.h.bf16 %v2475_v55 }
 0x637   : > { %v2218_v14 = vmul.f32 %v2187_v21, %v5543_v38  ;;  %v2213_v38 = vmul.f32 %v4620_v5, %v5496_v17  ;;  %v2208_v17 = vmul.f32 %v2137_v51, %v5468_v6  ;;  %v2329_v6 = vld [vmem:[%s5253_s26] sm:$0xff]  ;;  %v2483_v51 = vld [vmem:[%s6237_s30 + $0x48] sm:$0xff]  ;;  %2860 = vmatpush1.msra.mxu1 %v2540_v50  ;;  %v2507_v21 = vunpack.c.h.bf16 %v2474_v57 }
 0x638   : > { %v4632_v63 = vpop.f32.mrf.mxu1  ;;  %v2525_v5 = vunpack.c.h.bf16 %v2483_v51  ;;  %v2513_v50 = vunpack.c.h.bf16 %v2477_v39 }
 0x639   : > { %v2221_v15 = vmul.f32 %v4632_v63, %v5552_v44  ;;  %v2215_v44 = vmul.f32 %v4623_v9, %v5510_v23  ;;  %v2210_v23 = vmul.f32 %v2147_v53, %v5487_v13  ;;  %v2239_v13 = vpop.trf.xlu0  ;;  %v2482_v53 = vld [vmem:[%s6237_s30 + $0x40] sm:$0xff]  ;;  %v2524_v9 = vunpack.c.l.bf16 %v2483_v51 }
 0x63a   : > { %v2197_v60 = vpop.f32.mrf.mxu1  ;;  %v2523_v54 = vunpack.c.h.bf16 %v2482_v53  ;;  %v2522_v56 = vunpack.c.l.bf16 %v2482_v53  ;;  %2861 = vmatprep.subr.mxu1 %v2525_v5  ;;  %v2508_v63 = vunpack.c.l.bf16 %v2475_v55  ;;  %v2503_v53 = vld [vmem:[%s6237_s30 + $0xe8] sm:$0xff]  ;;  %v2510_v5 = vunpack.c.l.bf16 %v2476_v46 }
 0x63b   : > { %v2220_v8 = vmul.f32 %v2197_v60, %v5557_v59  ;;  %4633 = vmatprep.subr.mxu0 %v2221_v15  ;;  %v2332_v59 = vld [vmem:[%s5253_s26 + $0x18] sm:$0xff]  ;;  %2862 = vmatpush1.msra.mxu1 %v2524_v9  ;;  %v4944_v60 = vmov 0.0   ;;  %v2512_v9 = vunpack.c.l.bf16 %v2477_v39 }
 0x63c   : > { %4634 = vmatpush3.msra.mxu0 %v2221_v15  ;;  %v2506_v15 = vunpack.c.l.bf16 %v2474_v57  ;;  %2863 = vmatprep.subr.mxu1 %v2509_v16  ;;  %v2494_v57 = vld [vmem:[%s6237_s30 + $0xa0] sm:$0xff]  ;;  %v2495_v16 = vld [vmem:[%s6237_s30 + $0xa8] sm:$0xff] }
 0x63d   : > { %4635 = vmatprep.subr.mxu0 %v2220_v8  ;;  %2864 = vmatpush1.msra.mxu1 %v2508_v63  ;;  %v2564_v63 = vunpack.c.l.bf16 %v2503_v53 }
 0x63e   : > { %4636 = vmatpush3.msra.mxu0 %v2220_v8  ;;  %2897 = vmatprep.mubr.f32.mxu1 %v4944_v60  ;;  %v2500_v8 = vld [vmem:[%s6237_s30 + $0xd0] sm:$0xff] }
 0x63f   : > { %4637 = vmatprep.subr.mxu0 %v2219_v22 }
 0x640   : > { %4638 = vmatpush3.msra.mxu0 %v2219_v22  ;;  %v2501_v22 = vld [vmem:[%s6237_s30 + $0xd8] sm:$0xff] }
 0x641   : > { %4639 = vmatprep.subr.mxu0 %v2218_v14 }
 0x642   : > { %4640 = vmatpush3.msra.mxu0 %v2218_v14  ;;  %v2559_v14 = vunpack.c.h.bf16 %v2500_v8 }
 0x643   : > { %4641 = vmatprep.subr.mxu0 %v2217_v31 }
 0x644   : > { %4642 = vmatpush3.msra.mxu0 %v2217_v31  ;;  %v2561_v31 = vunpack.c.h.bf16 %v2501_v22 }
 0x645   : > { %4643 = vmatprep.subr.mxu0 %v2216_v33 }
 0x646   : > { %4644 = vmatpush3.msra.mxu0 %v2216_v33  ;;  %3011 = vmatprep.subr.mxu1 %v2561_v31  ;;  %v2546_v31 = vunpack.c.l.bf16 %v2494_v57 }
 0x647   : > { %4645 = vmatprep.subr.mxu0 %v2215_v44 }
 0x648   : > { %4646 = vmatpush3.msra.mxu0 %v2215_v44 }
 0x649   : > { %4647 = vmatprep.subr.mxu0 %v2214_v36 }
 0x64a   : > { %4648 = vmatpush3.msra.mxu0 %v2214_v36 }
 0x64b   : > { %4649 = vmatprep.subr.mxu0 %v2213_v38 }
 0x64c   : > { %4650 = vmatpush3.msra.mxu0 %v2213_v38 }
 0x64d   : > { %4651 = vmatprep.subr.mxu0 %v2212_v30 }
 0x64e   : > { %4652 = vmatpush3.msra.mxu0 %v2212_v30 }
 0x64f   : > { %4653 = vmatprep.subr.mxu0 %v2211_v32 }
 0x650   : > { %4654 = vmatpush3.msra.mxu0 %v2211_v32 }
 0x651   : > { %4655 = vmatprep.subr.mxu0 %v2210_v23 }
 0x652   : > { %4656 = vmatpush3.msra.mxu0 %v2210_v23 }
 0x653   : > { %4657 = vmatprep.subr.mxu0 %v2209_v25 }
 0x654   : > { %4658 = vmatpush3.msra.mxu0 %v2209_v25 }
 0x655   : > { %4659 = vmatprep.subr.mxu0 %v2208_v17 }
 0x656   : > { %4660 = vmatpush3.msra.mxu0 %v2208_v17 }
 0x657   : > { %4661 = vmatprep.subr.mxu0 %v2207_v19 }
 0x658   : > { %4662 = vmatpush3.msra.mxu0 %v2207_v19 }
 0x659   : > { %4663 = vmatprep.subr.mxu0 %v2206_v10 }
 0x65a   : > { %4664 = vmatpush3.msra.mxu0 %v2206_v10 }
 0x65b   : > { %4666 = vmatmul.mubr.f32.vlgmr.msra.gmra.mxu0 %v2239_v13  ;;  %4668 = vmatprep.subr.mxu0 %v2332_v59 }
 0x65c   : > { %4669 = vmatpush3.msra.mxu0 %v2332_v59 }
 0x65d   : > { %4670 = vmatprep.subr.mxu0 %v2331_v7 }
 0x65e   : > { %4671 = vmatpush3.msra.mxu0 %v2331_v7 }
 0x65f   : > { %4672 = vmatprep.subr.mxu0 %v2330_v1 }
 0x660   : > { %4673 = vmatpush3.msra.mxu0 %v2330_v1 }
 0x661   : > { %4674 = vmatprep.subr.mxu0 %v2329_v6 }
 0x662   : > { %4675 = vmatpush3.msra.mxu0 %v2329_v6 }
 0x663   : > { %2780 = vmatprep.subr.mxu0 %v2555_v2 }
 0x71b   : > { %v4667_v0 = vpop.f32.mrf.mxu0 }
 0x71d   : > { %v2320_v35 = vpop.f32.mrf.mxu0 }
 0x71e   : > { %4676 = vmatprep.mubr.msk.f32.mxu0 %vm1174_vm4, %v2320_v35 }
 0x71f   : > { %4677 = vmatmul.mubr.msk.f32.vlgmr.msra.gmra.mxu0 %vm1174_vm4, %v4667_v0 }
 0x720   : > { %2781 = vmatpush1.msra.mxu0 %v2554_v48  ;;  %2820 = vmatprep.mubr.f32.mxu0 %v4944_v60 }
 0x721   : > { %2782 = vmatprep.subr.mxu0 %v2539_v49  ;;  %v2511_v49 = vunpack.c.h.bf16 %v2476_v46 }
 0x722   : > { %2783 = vmatpush1.msra.mxu0 %v2538_v52  ;;  %v2502_v52 = vld [vmem:[%s6237_s30 + $0xe0] sm:$0xff] }
 0x723   : > { %2784 = vmatprep.subr.mxu0 %v2523_v54  ;;  %v2563_v55 = vunpack.c.h.bf16 %v2502_v52 }
 0x724   : > { %2785 = vmatpush1.msra.mxu0 %v2522_v56  ;;  %v2565_v56 = vunpack.c.h.bf16 %v2503_v53  ;;  %v2578_v53 = vld [vmem:[%s6241_s1 + $0x40] sm:$0xff] }
 0x725   : > { %2786 = vmatprep.subr.mxu0 %v2507_v21  ;;  %v2562_v21 = vunpack.c.l.bf16 %v2502_v52 }
 0x726   : > { %2787 = vmatpush1.msra.mxu0 %v2506_v15  ;;  %v2547_v15 = vunpack.c.h.bf16 %v2494_v57  ;;  %v2618_v57 = vunpack.c.l.bf16 %v2578_v53 }
 0x727   : > { %2934 = vmatprep.subr.mxu0 %v2559_v14  ;;  %v2487_v14 = vld [vmem:[%s6237_s30 + $0x68] sm:$0xff] }
 0x7df   : > { %v4678_v26 = vpop.f32.mrf.mxu0 }
 0x7e0   : > { %v2418_v27 = vadd.f32 %v4678_v26, %v4375_v18  ;;  %v4378_v26 = vld [vmem:[%s6239_s24] ss:$0 sm:$0xff] }
 0x7e1   : > { %v2412_v62 = vpop.f32.mrf.mxu0 }
 0x7e2   : > { %v2413_v29 = vadd.f32 %v4375_v18, %v2412_v62  ;;  %v5883_v24 = vadd.f32 %v4812_v12, %v2418_v27  ;;  %v4379_v62 = vld [vmem:[%s6240_s27] ss:$0 sm:$0xff] }
 0x7e4   : > { %v5877_v58 = vadd.f32 %v4811_v37, %v2413_v29  ;;  %v2428_v41 = vsel %vm1174_vm4, %v5883_v24, 0.0  ;;  %v2435_v20 = vmul.f32 %v5883_v24, %v5883_v24  ;;  %v2492_v29 = vld [vmem:[%s6237_s30 + $0x90] sm:$0xff]  ;;  %v2493_v37 = vld [vmem:[%s6237_s30 + $0x98] sm:$0xff] }
 0x7e5   : > { %v2543_v12 = vunpack.c.h.bf16 %v2492_v29  ;;  %v2542_v34 = vunpack.c.l.bf16 %v2492_v29  ;;  %v2544_v45 = vunpack.c.l.bf16 %v2493_v37  ;;  %v2488_v29 = vld [vmem:[%s6237_s30 + $0x70] sm:$0xff] }
 0x7e6   : > { %v2425_v42 = vsel %vm1174_vm4, %v5877_v58, 0.0  ;;  %v2434_v11 = vmul.f32 %v5877_v58, %v5877_v58  ;;  %v2439_v43 = vsel %vm1174_vm4, %v2435_v20, 0.0  ;;  %v2485_v20 = vld [vmem:[%s6237_s30 + $0x58] sm:$0xff] }
 0x7e7   : > { %2426 = vadd.xlane.f32.xlu1 %v2425_v42  ;;  %v2558_v42 = vunpack.c.l.bf16 %v2500_v8  ;;  %v2529_v48 = vunpack.c.h.bf16 %v2485_v20  ;;  %v2528_v61 = vunpack.c.l.bf16 %v2485_v20  ;;  %v2549_v8 = vunpack.c.h.bf16 %v2495_v16 }
 0x7e8   : > { %v2436_v28 = vsel %vm1174_vm4, %v2434_v11, 0.0  ;;  %v2560_v11 = vunpack.c.l.bf16 %v2501_v22  ;;  %v2486_v22 = vld [vmem:[%s6237_s30 + $0x60] sm:$0xff]  ;;  %v2534_v20 = vunpack.c.l.bf16 %v2488_v29 }
 0x7eb   : > { %2437 = vadd.xlane.f32.xlu1 %v2436_v28  ;;  %v2545_v28 = vunpack.c.h.bf16 %v2493_v37  ;;  %v2489_v37 = vld [vmem:[%s6237_s30 + $0x78] sm:$0xff] }
 0x7ef   : > { %2429 = vadd.xlane.f32.xlu1 %v2428_v41  ;;  %v2484_v41 = vld [vmem:[%s6237_s30 + $0x50] sm:$0xff] }
 0x7f0   : > { %v2527_v47 = vunpack.c.h.bf16 %v2484_v41 }
 0x7f3   : > { %2440 = vadd.xlane.f32.xlu1 %v2439_v43 }
 0x870   : > { %v2427_v33 = vpop.xlane.xlu1 %2426 }
 0x871   : > { %v2432_v44 = vmul.f32 0.03125, %v2427_v33  ;;  %v2548_v33 = vunpack.c.l.bf16 %v2495_v16 }
 0x873   : > { %v2444_v38 = vmul.f32 %v2432_v44, %v2432_v44  ;;  %v2450_v0 = vsub.f32 %v5877_v58, %v2432_v44  ;;  %v2478_v44 = vld [vmem:[%s6237_s30 + $0x20] sm:$0xff] }
 0x874   : > { %v2438_v36 = vpop.xlane.xlu1 %2437 }
 0x875   : > { %v2442_v30 = vmul.f32 0.03125, %v2438_v36  ;;  %v2479_v36 = vld [vmem:[%s6237_s30 + $0x28] sm:$0xff] }
 0x877   : > { %v2446_v32 = vsub.f32 %v2442_v30, %v2444_v38  ;;  %v2531_v38 = vunpack.c.h.bf16 %v2486_v22  ;;  %v2533_v30 = vunpack.c.h.bf16 %v2487_v14 }
 0x878   : > { %v2430_v23 = vpop.xlane.xlu1 %2429 }
 0x879   : > { %v2448_v25 = vmax.f32 %v2446_v32, 0.0  ;;  %v2433_v17 = vmul.f32 0.03125, %v2430_v23  ;;  %v2530_v32 = vunpack.c.l.bf16 %v2486_v22  ;;  %v2532_v23 = vunpack.c.l.bf16 %v2487_v14 }
 0x87b   : > { %v2452_v19 = vadd.f32 1e-05, %v2448_v25  ;;  %v2445_v13 = vmul.f32 %v2433_v17, %v2433_v17  ;;  %v2451_v43 = vsub.f32 %v5883_v24, %v2433_v17  ;;  %v2526_v24 = vunpack.c.l.bf16 %v2484_v41 }
 0x87c   : > { %v2441_v10 = vpop.xlane.xlu1 %2440  ;;  %v2515_v25 = vunpack.c.h.bf16 %v2478_v44  ;;  %v2517_v17 = vunpack.c.h.bf16 %v2479_v36  ;;  %v2537_v41 = vunpack.c.h.bf16 %v2489_v37 }
 0x87d   : > { %4803 = vrsqrt.f32 %v2452_v19  ;;  %v2443_v59 = vmul.f32 0.03125, %v2441_v10  ;;  %v2514_v19 = vunpack.c.l.bf16 %v2478_v44  ;;  %v2504_v10 = vld [vmem:[%s6237_s30 + $0xf0] sm:$0xff] }
 0x87f   : > { %v2447_v7 = vsub.f32 %v2443_v59, %v2445_v13  ;;  %v2505_v13 = vld [vmem:[%s6237_s30 + $0xf8] sm:$0xff]  ;;  %v2516_v59 = vunpack.c.l.bf16 %v2479_v36 }
 0x881   : > { %v2449_v1 = vmax.f32 %v2447_v7, 0.0  ;;  %v2496_v7 = vld [vmem:[%s6237_s30 + $0xb0] sm:$0xff] }
 0x883   : > { %v2453_v6 = vadd.f32 1e-05, %v2449_v1  ;;  %v2497_v1 = vld [vmem:[%s6237_s30 + $0xb8] sm:$0xff] }
 0x885   : > { %4805 = vrsqrt.f32 %v2453_v6  ;;  %v2567_v6 = vunpack.c.h.bf16 %v2504_v10 }
 0x88a   : > { %v4804_v35 = vpop.eup %4803 }
 0x88b   : > { %v2456_v18 = vmul.f32 %v4804_v35, %v2450_v0  ;;  %v2569_v0 = vunpack.c.h.bf16 %v2505_v13  ;;  %v2566_v35 = vunpack.c.l.bf16 %v2504_v10 }
 0x88d   : > { %v2464_v27 = vmul.f32 %v4378_v26, %v2456_v18  ;;  %v2551_v18 = vunpack.c.h.bf16 %v2496_v7 }
 0x88f   : > { %v5916_v58 = vadd.f32 %v4379_v62, %v2464_v27  ;;  %v2550_v27 = vunpack.c.l.bf16 %v2496_v7 }
 0x891   : > { %4380 = vmatmul.mubr.msk.f32.vlgmr.msra.gmra.mxu0 %vm1174_vm4, %v5916_v58  ;;  %4382 = vmatmul.mubr.msk.f32.vlgmr.msra.gmra.mxu1 %vm1174_vm4, %v5916_v58 }
 0x892   : > { %v4806_v2 = vpop.eup %4805  ;;  %2935 = vmatpush1.msra.mxu0 %v2558_v42  ;;  %3012 = vmatpush1.msra.mxu1 %v2560_v11  ;;  %v2552_v42 = vunpack.c.l.bf16 %v2497_v1  ;;  %v2480_v11 = vld [vmem:[%s6237_s30 + $0x30] sm:$0xff] }
 0x893   : > { %v2457_v40 = vmul.f32 %v4806_v2, %v2451_v43  ;;  %2936 = vmatprep.subr.mxu0 %v2543_v12  ;;  %3013 = vmatprep.subr.mxu1 %v2545_v28  ;;  %v2481_v12 = vld [vmem:[%s6237_s30 + $0x38] sm:$0xff]  ;;  %v2535_v28 = vunpack.c.h.bf16 %v2488_v29  ;;  %v2536_v43 = vunpack.c.l.bf16 %v2489_v37  ;;  %v2518_v46 = vunpack.c.l.bf16 %v2480_v11  ;;  %v2594_v2 = vld [vmem:[%s6241_s1 + $0xc0] sm:$0xff] }
 0x894   : > { %2826 = vmatprep.mubr.f32.mxu0 %v4944_v60  ;;  %2903 = vmatprep.mubr.f32.mxu1 %v4944_v60  ;;  %v2520_v39 = vunpack.c.l.bf16 %v2481_v12 }
 0x895   : > { %v2465_v51 = vmul.f32 %v4378_v26, %v2457_v40  ;;  %2937 = vmatpush1.msra.mxu0 %v2542_v34  ;;  %3014 = vmatpush1.msra.mxu1 %v2544_v45  ;;  %v2568_v26 = vunpack.c.l.bf16 %v2505_v13  ;;  %v2519_v34 = vunpack.c.h.bf16 %v2480_v11  ;;  %v2521_v45 = vunpack.c.h.bf16 %v2481_v12 }
 0x896   : > { %2938 = vmatprep.subr.mxu0 %v2527_v47  ;;  %3015 = vmatprep.subr.mxu1 %v2529_v48  ;;  %v2595_v47 = vld [vmem:[%s6241_s1 + $0xc8] sm:$0xff]  ;;  %v2651_v48 = vunpack.c.h.bf16 %v2594_v2 }
 0x897   : > { %v5931_v54 = vadd.f32 %v4379_v62, %v2465_v51  ;;  %2939 = vmatpush1.msra.mxu0 %v2526_v24  ;;  %3016 = vmatpush1.msra.mxu1 %v2528_v61  ;;  %v2553_v62 = vunpack.c.h.bf16 %v2497_v1  ;;  %v2653_v40 = vunpack.c.h.bf16 %v2595_v47  ;;  %v2586_v24 = vld [vmem:[%s6241_s1 + $0x80] sm:$0xff]  ;;  %v2587_v61 = vld [vmem:[%s6241_s1 + $0x88] sm:$0xff] }
 0x898   : > { %2940 = vmatprep.subr.mxu0 %v2511_v49  ;;  %3017 = vmatprep.subr.mxu1 %v2513_v50  ;;  %v2650_v49 = vunpack.c.l.bf16 %v2594_v2  ;;  %v2652_v50 = vunpack.c.l.bf16 %v2595_v47  ;;  %v2635_v51 = vunpack.c.h.bf16 %v2586_v24  ;;  %v2637_v52 = vunpack.c.h.bf16 %v2587_v61 }
 0x899   : > { %4381 = vmatmul.mubr.msk.f32.gmra.mxu0 %vm1174_vm4, %v5931_v54  ;;  %4383 = vmatmul.mubr.msk.f32.gmra.mxu1 %vm1174_vm4, %v5931_v54  ;;  %v2688_v2 = vsub.s32 4, %v5568_v3  ;;  %v2696_v47 = vsub.s32 6, %v5568_v3 }
 0x89a   : > { %2941 = vmatpush1.msra.mxu0 %v2510_v5  ;;  %2974 = vmatprep.mubr.f32.mxu0 %v4944_v60  ;;  %v2579_v5 = vld [vmem:[%s6241_s1 + $0x48] sm:$0xff] }
 0x89b   : > { %3018 = vmatpush1.msra.mxu1 %v2512_v9  ;;  %3051 = vmatprep.mubr.f32.mxu1 %v4944_v60  ;;  %v2634_v9 = vunpack.c.l.bf16 %v2586_v24  ;;  %v2620_v16 = vunpack.c.l.bf16 %v2579_v5 }
 0x89c   : > { %3088 = vmatprep.subr.mxu0 %v2563_v55  ;;  %3165 = vmatprep.subr.mxu1 %v2565_v56  ;;  %v2636_v55 = vunpack.c.l.bf16 %v2587_v61  ;;  %v2619_v56 = vunpack.c.h.bf16 %v2578_v53 }
 0x89d   : > { %4384 = vmatmul.mubr.msk.f32.vlgmr.msra.gmra.mxu0 %vm1174_vm4, %v5916_v58  ;;  %4386 = vmatmul.mubr.msk.f32.vlgmr.msra.gmra.mxu1 %vm1174_vm4, %v5916_v58 }
 0x89e   : > { %3089 = vmatpush1.msra.mxu0 %v2562_v21  ;;  %3166 = vmatpush1.msra.mxu1 %v2564_v63  ;;  %v2570_v21 = vld [vmem:[%s6241_s1] sm:$0xff]  ;;  %v2571_v63 = vld [vmem:[%s6241_s1 + $0x8] sm:$0xff] }
 0x89f   : > { %3090 = vmatprep.subr.mxu0 %v2547_v15  ;;  %3167 = vmatprep.subr.mxu1 %v2549_v8  ;;  %v2602_v15 = vunpack.c.l.bf16 %v2570_v21  ;;  %v2603_v8 = vunpack.c.h.bf16 %v2570_v21  ;;  %v2604_v22 = vunpack.c.l.bf16 %v2571_v63  ;;  %v2605_v14 = vunpack.c.h.bf16 %v2571_v63 }
 0x8a0   : > { %2980 = vmatprep.mubr.f32.mxu0 %v4944_v60  ;;  %3057 = vmatprep.mubr.f32.mxu1 %v4944_v60 }
 0x8a1   : > { %3091 = vmatpush1.msra.mxu0 %v2546_v31  ;;  %3168 = vmatpush1.msra.mxu1 %v2548_v33  ;;  %v2596_v31 = vld [vmem:[%s6241_s1 + $0xd0] sm:$0xff]  ;;  %v2597_v33 = vld [vmem:[%s6241_s1 + $0xd8] sm:$0xff] }
 0x8a2   : > { %4385 = vmatmul.mubr.msk.f32.gmra.mxu0 %vm1174_vm4, %v5931_v54  ;;  %4387 = vmatmul.mubr.msk.f32.gmra.mxu1 %vm1174_vm4, %v5931_v54  ;;  %v2655_v44 = vunpack.c.h.bf16 %v2596_v31  ;;  %v2657_v36 = vunpack.c.h.bf16 %v2597_v33 }
 0x8a3   : > { %3092 = vmatprep.subr.mxu0 %v2531_v38  ;;  %3169 = vmatprep.subr.mxu1 %v2533_v30  ;;  %v2680_v38 = vsub.s32 2, %v5568_v3  ;;  %v2666_v30 = vld [vmem:[%s5271_s0] sm:$0xff] }
 0x8a4   : > { %3093 = vmatpush1.msra.mxu0 %v2530_v32  ;;  %3170 = vmatpush1.msra.mxu1 %v2532_v23  ;;  %v2676_v32 = vsub.s32 1, %v5568_v3  ;;  %v2684_v23 = vsub.s32 3, %v5568_v3  ;;  %v2697_v21 = vrot.slane %v2666_v30, %v2696_v47 }
 0x8a5   : > { %3094 = vmatprep.subr.mxu0 %v2515_v25  ;;  %3171 = vmatprep.subr.mxu1 %v2517_v17  ;;  %v2673_v25 = vrot.slane %v2666_v30, %v5571_v4  ;;  %v2681_v17 = vrot.slane %v2666_v30, %v2680_v38 }
 0x8a6   : > { %3095 = vmatpush1.msra.mxu0 %v2514_v19  ;;  %3128 = vmatprep.mubr.f32.mxu0 %v4944_v60  ;;  %v2677_v19 = vrot.slane %v2666_v30, %v2676_v32  ;;  %v2685_v10 = vrot.slane %v2666_v30, %v2684_v23 }
 0x8a7   : > { %3172 = vmatpush1.msra.mxu1 %v2516_v59  ;;  %3205 = vmatprep.mubr.f32.mxu1 %v4944_v60 }
 0x8a8   : > { %4388 = vmatmul.mubr.msk.f32.vlgmr.msra.gmra.mxu0 %vm1174_vm4, %v5916_v58  ;;  %4390 = vmatmul.mubr.msk.f32.vlgmr.msra.gmra.mxu1 %vm1174_vm4, %v5916_v58 }
 0x8a9   : > { %3242 = vmatprep.subr.mxu0 %v2567_v6  ;;  %3319 = vmatprep.subr.mxu1 %v2569_v0 }
 0x8aa   : > { %3243 = vmatpush1.msra.mxu0 %v2566_v35  ;;  %3320 = vmatpush1.msra.mxu1 %v2568_v26 }
 0x8ab   : > { %3244 = vmatprep.subr.mxu0 %v2551_v18  ;;  %3321 = vmatprep.subr.mxu1 %v2553_v62  ;;  %v2588_v18 = vld [vmem:[%s6241_s1 + $0x90] sm:$0xff]  ;;  %v2589_v62 = vld [vmem:[%s6241_s1 + $0x98] sm:$0xff] }
 0x8ac   : > { %3134 = vmatprep.mubr.f32.mxu0 %v4944_v60  ;;  %3211 = vmatprep.mubr.f32.mxu1 %v4944_v60 }
 0x8ad   : > { %3245 = vmatpush1.msra.mxu0 %v2550_v27  ;;  %3322 = vmatpush1.msra.mxu1 %v2552_v42  ;;  %v2654_v27 = vunpack.c.l.bf16 %v2596_v31  ;;  %v2656_v42 = vunpack.c.l.bf16 %v2597_v33 }
 0x8ae   : > { %4389 = vmatmul.mubr.msk.f32.gmra.mxu0 %vm1174_vm4, %v5931_v54  ;;  %4391 = vmatmul.mubr.msk.f32.gmra.mxu1 %vm1174_vm4, %v5931_v54 }
 0x8af   : > { %3246 = vmatprep.subr.mxu0 %v2535_v28  ;;  %3323 = vmatprep.subr.mxu1 %v2537_v41  ;;  %v2639_v28 = vunpack.c.h.bf16 %v2588_v18  ;;  %v2641_v41 = vunpack.c.h.bf16 %v2589_v62 }
 0x8b0   : > { %3247 = vmatpush1.msra.mxu0 %v2534_v20  ;;  %3324 = vmatpush1.msra.mxu1 %v2536_v43  ;;  %v2692_v20 = vsub.s32 5, %v5568_v3  ;;  %v2700_v43 = vsub.s32 7, %v5568_v3 }
 0x8b1   : > { %3248 = vmatprep.subr.mxu0 %v2519_v34  ;;  %3325 = vmatprep.subr.mxu1 %v2521_v45  ;;  %v2580_v34 = vld [vmem:[%s6241_s1 + $0x50] sm:$0xff]  ;;  %v2581_v45 = vld [vmem:[%s6241_s1 + $0x58] sm:$0xff] }
 0x8b2   : > { %3249 = vmatpush1.msra.mxu0 %v2518_v46  ;;  %3282 = vmatprep.mubr.f32.mxu0 %v4944_v60 }
 0x8b3   : > { %3326 = vmatpush1.msra.mxu1 %v2520_v39  ;;  %3359 = vmatprep.mubr.f32.mxu1 %v4944_v60 }
 0x8b4   : > { %4392 = vmatmul.mubr.msk.f32.vlgmr.msra.gmra.mxu0 %vm1174_vm4, %v5916_v58  ;;  %4394 = vmatmul.mubr.msk.f32.vlgmr.msra.gmra.mxu1 %vm1174_vm4, %v5916_v58 }
 0x8b5   : > { %3288 = vmatprep.mubr.f32.mxu0 %v4944_v60  ;;  %3365 = vmatprep.mubr.f32.mxu1 %v4944_v60  ;;  %v2621_v60 = vunpack.c.h.bf16 %v2579_v5 }
 0x8b6   : > { %3435 = vmatprep.subr.mxu0 %v2651_v48  ;;  %3510 = vmatprep.subr.mxu1 %v2653_v40  ;;  %v2638_v48 = vunpack.c.l.bf16 %v2588_v18  ;;  %v2640_v40 = vunpack.c.l.bf16 %v2589_v62 }
 0x8b7   : > { %3436 = vmatpush1.xpose.msra.mxu0 %v2650_v49  ;;  %3511 = vmatpush1.xpose.msra.mxu1 %v2652_v50 }
 0x8b8   : > { %4393 = vmatmul.mubr.msk.f32.gmra.mxu0 %vm1174_vm4, %v5931_v54  ;;  %4395 = vmatmul.mubr.msk.f32.gmra.mxu1 %vm1174_vm4, %v5931_v54 }
 0x8b9   : > { %3437 = vmatprep.subr.mxu0 %v2635_v51  ;;  %3512 = vmatprep.subr.mxu1 %v2637_v52  ;;  %v2623_v51 = vunpack.c.h.bf16 %v2580_v34  ;;  %v2625_v52 = vunpack.c.h.bf16 %v2581_v45 }
 0x8bb   : > { %3438 = vmatpush1.xpose.msra.mxu0 %v2634_v9  ;;  %3513 = vmatpush1.xpose.msra.mxu1 %v2636_v55  ;;  %v2693_v9 = vrot.slane %v2666_v30, %v2692_v20  ;;  %v2701_v55 = vrot.slane %v2666_v30, %v2700_v43 }
 0x8bc   : > { %3439 = vmatprep.subr.mxu0 %v2619_v56  ;;  %3514 = vmatprep.subr.mxu1 %v2621_v60  ;;  %v2572_v56 = vld [vmem:[%s6241_s1 + $0x10] sm:$0xff]  ;;  %v2573_v60 = vld [vmem:[%s6241_s1 + $0x18] sm:$0xff] }
 0x8bf   : > { %3440 = vmatpush1.xpose.msra.mxu0 %v2618_v57  ;;  %3515 = vmatpush1.xpose.msra.mxu1 %v2620_v16  ;;  %v2689_v57 = vrot.slane %v2666_v30, %v2688_v2  ;;  %v2598_v30 = vld [vmem:[%s6241_s1 + $0xe0] sm:$0xff] }
 0x8c0   : > { %3441 = vmatprep.subr.mxu0 %v2603_v8  ;;  %3516 = vmatprep.subr.mxu1 %v2605_v14  ;;  %v2624_v14 = vunpack.c.l.bf16 %v2581_v45  ;;  %v2659_v62 = vunpack.c.h.bf16 %v2598_v30  ;;  %v2591_v45 = vld [vmem:[%s6241_s1 + $0xa8] sm:$0xff] }
 0x8c3   : > { %3442 = vmatpush1.xpose.msra.mxu0 %v2602_v15  ;;  %3517 = vmatpush1.xpose.msra.mxu1 %v2604_v22  ;;  %v2622_v22 = vunpack.c.l.bf16 %v2580_v34  ;;  %v2590_v34 = vld [vmem:[%s6241_s1 + $0xa0] sm:$0xff] }
 0x8c4   : > { %3585 = vmatprep.subr.mxu0 %v2655_v44  ;;  %3660 = vmatprep.subr.mxu1 %v2657_v36 }
 0x951   : > { %v2822_v13 = vpop.f32.mrf.mxu0  ;;  %v2899_v59 = vpop.f32.mrf.mxu1 }
 0x952   : > { %v2823_v7 = vadd.f32 %v2822_v13, %v2673_v25  ;;  %v2900_v1 = vadd.f32 %v2899_v59, %v2681_v17  ;;  %v2599_v13 = vld [vmem:[%s6241_s1 + $0xe8] sm:$0xff]  ;;  %v2606_v59 = vunpack.c.l.bf16 %v2572_v56 }
 0x953   : > { %v2824_v6 = vpop.f32.mrf.mxu0  ;;  %v2901_v0 = vpop.f32.mrf.mxu1 }
 0x954   : > { %v2825_v35 = vadd.f32 %v2824_v6, %v2677_v19  ;;  %v2902_v26 = vadd.f32 %v2901_v0, %v2685_v10  ;;  %v3372_v11 = vmax.f32 %v2823_v7, 0.0  ;;  %v3374_v12 = vmax.f32 %v2900_v1, 0.0 }
 0x955   : > { %v2608_v7 = vunpack.c.l.bf16 %v2573_v60 }
 0x956   : > { %v3373_v29 = vmax.f32 %v2825_v35, 0.0  ;;  %v3375_v37 = vmax.f32 %v2902_v26, 0.0 }
 0x958   : > { %3475 = vmatprep.mubr.f32.mxu0 %v3373_v29  ;;  %3550 = vmatprep.mubr.f32.mxu1 %v3375_v37  ;;  %v2661_v29 = vunpack.c.h.bf16 %v2599_v13 }
 0x959   : > { %v2828_v46 = vpop.f32.mrf.mxu0  ;;  %v2905_v39 = vpop.f32.mrf.mxu1  ;;  %3476 = vmatmul.mubr.f32.vlgmr.msra.gmra.mxu0 %v3372_v11  ;;  %3551 = vmatmul.mubr.f32.vlgmr.msra.gmra.mxu1 %v3374_v12 }
 0x95a   : > { %3586 = vmatpush1.xpose.msra.mxu0 %v2654_v27  ;;  %3661 = vmatpush1.xpose.msra.mxu1 %v2656_v42  ;;  %v2829_v24 = vadd.f32 %v2828_v46, %v2673_v25  ;;  %v2906_v61 = vadd.f32 %v2905_v39, %v2681_v17  ;;  %v2607_v25 = vunpack.c.h.bf16 %v2572_v56  ;;  %v2609_v17 = vunpack.c.h.bf16 %v2573_v60  ;;  %v6029_v42 = vld [vmem:[%s5271_s0 + $0x8] sm:$0xff] }
 0x95b   : > { %v2830_v49 = vpop.f32.mrf.mxu0  ;;  %v2907_v50 = vpop.f32.mrf.mxu1  ;;  %3587 = vmatprep.subr.mxu0 %v2639_v28  ;;  %3662 = vmatprep.subr.mxu1 %v2641_v41  ;;  %v6034_v28 = vrot.slane %v6029_v42, %v2676_v32  ;;  %v6039_v41 = vrot.slane %v6029_v42, %v2684_v23  ;;  %v2643_v23 = vunpack.c.h.bf16 %v2590_v34  ;;  %v2583_v56 = vld [vmem:[%s6241_s1 + $0x68] sm:$0xff] }
 0x95c   : > { %v2831_v53 = vadd.f32 %v2830_v49, %v2677_v19  ;;  %v2908_v5 = vadd.f32 %v2907_v50, %v2685_v10  ;;  %v3388_v31 = vmax.f32 %v2829_v24, 0.0  ;;  %v3390_v33 = vmax.f32 %v2906_v61, 0.0 }
 0x95d   : > { %v2976_v16 = vpop.f32.mrf.mxu0  ;;  %v3053_v63 = vpop.f32.mrf.mxu1 }
 0x95e   : > { %v3389_v15 = vmax.f32 %v2831_v53, 0.0  ;;  %v3391_v8 = vmax.f32 %v2908_v5, 0.0  ;;  %3588 = vmatpush1.xpose.msra.mxu0 %v2638_v48  ;;  %3663 = vmatpush1.xpose.msra.mxu1 %v2640_v40  ;;  %v2977_v1 = vadd.f32 %v2976_v16, %v2689_v57  ;;  %v3054_v6 = vadd.f32 %v3053_v63, %v2697_v21 }
 0x95f   : > { %v2978_v44 = vpop.f32.mrf.mxu0  ;;  %v3055_v36 = vpop.f32.mrf.mxu1  ;;  %3589 = vmatprep.subr.mxu0 %v2623_v51  ;;  %3664 = vmatprep.subr.mxu1 %v2625_v52  ;;  %v2658_v48 = vunpack.c.l.bf16 %v2598_v30  ;;  %v2660_v40 = vunpack.c.l.bf16 %v2599_v13  ;;  %v2645_v52 = vunpack.c.h.bf16 %v2591_v45  ;;  %v2644_v63 = vunpack.c.l.bf16 %v2591_v45 }
 0x960   : > { %v2979_v19 = vadd.f32 %v2978_v44, %v2693_v9  ;;  %v3056_v10 = vadd.f32 %v3055_v36, %v2701_v55  ;;  %3480 = vmatprep.mubr.f32.mxu0 %v3389_v15  ;;  %3555 = vmatprep.mubr.f32.mxu1 %v3391_v8  ;;  %v3376_v46 = vmax.f32 %v2977_v1, 0.0  ;;  %v3378_v39 = vmax.f32 %v3054_v6, 0.0  ;;  %v2575_v36 = vld [vmem:[%s6241_s1 + $0x28] sm:$0xff]  ;;  %v2600_v1 = vld [vmem:[%s6241_s1 + $0xf0] sm:$0xff]  ;;  %v2601_v6 = vld [vmem:[%s6241_s1 + $0xf8] sm:$0xff] }
 0x961   : > { %3481 = vmatmul.mubr.f32.gmra.mxu0 %v3388_v31  ;;  %3556 = vmatmul.mubr.f32.gmra.mxu1 %v3390_v33  ;;  %v2574_v31 = vld [vmem:[%s6241_s1 + $0x20] sm:$0xff]  ;;  %v2628_v30 = vunpack.c.l.bf16 %v2583_v56  ;;  %v6071_v45 = vrot.slane %v6029_v42, %v2700_v43 }
 0x962   : > { %v3377_v0 = vmax.f32 %v2979_v19, 0.0  ;;  %v3379_v35 = vmax.f32 %v3056_v10, 0.0  ;;  %v2982_v26 = vpop.f32.mrf.mxu0  ;;  %v3059_v18 = vpop.f32.mrf.mxu1  ;;  %3590 = vmatpush1.xpose.msra.mxu0 %v2622_v22  ;;  %3665 = vmatpush1.xpose.msra.mxu1 %v2624_v14  ;;  %v2629_v14 = vunpack.c.h.bf16 %v2583_v56  ;;  %v2611_v13 = vunpack.c.h.bf16 %v2574_v31 }
 0x963   : > { %3591 = vmatprep.subr.mxu0 %v2607_v25  ;;  %3666 = vmatprep.subr.mxu1 %v2609_v17  ;;  %v2983_v24 = vadd.f32 %v2982_v26, %v2689_v57  ;;  %v3060_v61 = vadd.f32 %v3059_v18, %v2697_v21  ;;  %v2705_v17 = vrot.slane %v6029_v42, %v5571_v4  ;;  %v2612_v18 = vunpack.c.l.bf16 %v2575_v36 }
 0x964   : > { %v2984_v37 = vpop.f32.mrf.mxu0  ;;  %v3061_v27 = vpop.f32.mrf.mxu1  ;;  %3625 = vmatprep.mubr.f32.mxu0 %v3377_v0  ;;  %3700 = vmatprep.mubr.f32.mxu1 %v3379_v35  ;;  %v2610_v0 = vunpack.c.l.bf16 %v2574_v31 }
 0x965   : > { %v2985_v11 = vadd.f32 %v2984_v37, %v2693_v9  ;;  %v3062_v12 = vadd.f32 %v3061_v27, %v2701_v55  ;;  %v2642_v9 = vunpack.c.l.bf16 %v2590_v34  ;;  %v2582_v55 = vld [vmem:[%s6241_s1 + $0x60] sm:$0xff]  ;;  %v3392_v60 = vmax.f32 %v2983_v24, 0.0 }
 0x966   : > { %3592 = vmatpush1.xpose.msra.mxu0 %v2606_v59  ;;  %3667 = vmatpush1.xpose.msra.mxu1 %v2608_v7  ;;  %v3394_v57 = vmax.f32 %v3060_v61, 0.0  ;;  %v2627_v22 = vunpack.c.h.bf16 %v2582_v55  ;;  %v2626_v25 = vunpack.c.l.bf16 %v2582_v55  ;;  %v2713_v59 = vrot.slane %v6029_v42, %v2680_v38 }
 0x967   : > { %v3393_v49 = vmax.f32 %v2985_v11, 0.0  ;;  %v3395_v32 = vmax.f32 %v3062_v12, 0.0  ;;  %3735 = vmatprep.subr.mxu0 %v2659_v62  ;;  %3810 = vmatprep.subr.mxu1 %v2661_v29  ;;  %v2613_v7 = vunpack.c.h.bf16 %v2575_v36  ;;  %v2663_v62 = vunpack.c.h.bf16 %v2600_v1  ;;  %v2592_v11 = vld [vmem:[%s6241_s1 + $0xb0] sm:$0xff] }
 0x968   : > { %v3130_v50 = vpop.f32.mrf.mxu0  ;;  %v3207_v51 = vpop.f32.mrf.mxu1  ;;  %v6064_v37 = vrot.slane %v6029_v42, %v2692_v20  ;;  %v2665_v27 = vunpack.c.h.bf16 %v2601_v6  ;;  %v2664_v20 = vunpack.c.l.bf16 %v2601_v6  ;;  %v2647_v24 = vunpack.c.h.bf16 %v2592_v11 }
 0x969   : > { %3626 = vmatmul.mubr.f32.vlgmr.msra.gmra.mxu0 %v3376_v46  ;;  %3701 = vmatmul.mubr.f32.vlgmr.msra.gmra.mxu1 %v3378_v39  ;;  %v3131_v35 = vadd.f32 %v3130_v50, %v2705_v17  ;;  %v3208_v29 = vadd.f32 %v3207_v51, %v2713_v59  ;;  %v2662_v39 = vunpack.c.l.bf16 %v2600_v1 }
 0x96a   : > { %v3132_v53 = vpop.f32.mrf.mxu0  ;;  %v3209_v5 = vpop.f32.mrf.mxu1  ;;  %3630 = vmatprep.mubr.f32.mxu0 %v3393_v49  ;;  %3705 = vmatprep.mubr.f32.mxu1 %v3395_v32 }
 0x96b   : > { %v3133_v16 = vadd.f32 %v3132_v53, %v6034_v28  ;;  %v3210_v21 = vadd.f32 %v3209_v5, %v6039_v41  ;;  %3736 = vmatpush1.xpose.msra.mxu0 %v2658_v48  ;;  %3811 = vmatpush1.xpose.msra.mxu1 %v2660_v40  ;;  %v3380_v48 = vmax.f32 %v3131_v35, 0.0  ;;  %v3382_v61 = vmax.f32 %v3208_v29, 0.0 }
 0x96c   : > { %3737 = vmatprep.subr.mxu0 %v2643_v23  ;;  %3812 = vmatprep.subr.mxu1 %v2645_v52  ;;  %v2584_v23 = vld [vmem:[%s6241_s1 + $0x70] sm:$0xff]  ;;  %v2585_v52 = vld [vmem:[%s6241_s1 + $0x78] sm:$0xff]  ;;  %v2646_v5 = vunpack.c.l.bf16 %v2592_v11 }
 0x96d   : > { %v3381_v15 = vmax.f32 %v3133_v16, 0.0  ;;  %v3383_v8 = vmax.f32 %v3210_v21, 0.0  ;;  %3631 = vmatmul.mubr.f32.gmra.mxu0 %v3392_v60  ;;  %3706 = vmatmul.mubr.f32.gmra.mxu1 %v3394_v57  ;;  %v2631_v60 = vunpack.c.h.bf16 %v2584_v23  ;;  %v2633_v16 = vunpack.c.h.bf16 %v2585_v52  ;;  %v2576_v21 = vld [vmem:[%s6241_s1 + $0x30] sm:$0xff] }
 0x96e   : > { %v3136_v33 = vpop.f32.mrf.mxu0  ;;  %v3213_v44 = vpop.f32.mrf.mxu1  ;;  %v2632_v31 = vunpack.c.l.bf16 %v2585_v52 }
 0x96f   : > { %3738 = vmatpush1.xpose.msra.mxu0 %v2642_v9  ;;  %3775 = vmatprep.mubr.f32.mxu0 %v3381_v15  ;;  %v3137_v40 = vadd.f32 %v3136_v33, %v2705_v17  ;;  %v2577_v15 = vld [vmem:[%s6241_s1 + $0x38] sm:$0xff]  ;;  %v2615_v33 = vunpack.c.h.bf16 %v2576_v21 }
 0x970   : > { %v3138_v19 = vpop.f32.mrf.mxu0  ;;  %v3215_v10 = vpop.f32.mrf.mxu1  ;;  %3813 = vmatpush1.xpose.msra.mxu1 %v2644_v63  ;;  %3850 = vmatprep.mubr.f32.mxu1 %v3383_v8  ;;  %v2617_v36 = vunpack.c.h.bf16 %v2577_v15 }
 0x971   : > { %3739 = vmatprep.subr.mxu0 %v2627_v22  ;;  %3814 = vmatprep.subr.mxu1 %v2629_v14  ;;  %v3139_v38 = vadd.f32 %v3138_v19, %v6034_v28  ;;  %v3216_v12 = vadd.f32 %v3215_v10, %v6039_v41  ;;  %v2593_v28 = vld [vmem:[%s6241_s1 + $0xb8] sm:$0xff]  ;;  %v3214_v41 = vadd.f32 %v3213_v44, %v2713_v59  ;;  %v3396_v53 = vmax.f32 %v3137_v40, 0.0  ;;  %v4396_v40 = vld [vmem:[%s973_s17] ss:$0 sm:$0xff] }
 0x972   : > { %v2649_v51 = vunpack.c.h.bf16 %v2593_v28  ;;  %v2648_v56 = vunpack.c.l.bf16 %v2593_v28  ;;  %v2630_v22 = vunpack.c.l.bf16 %v2584_v23  ;;  %v2721_v14 = vrot.slane %v6029_v42, %v2688_v2 }
 0x973   : > { %3740 = vmatpush1.xpose.msra.mxu0 %v2626_v25  ;;  %v3397_v49 = vmax.f32 %v3139_v38, 0.0  ;;  %v3399_v43 = vmax.f32 %v3216_v12, 0.0  ;;  %v3398_v9 = vmax.f32 %v3214_v41, 0.0  ;;  %v2729_v44 = vrot.slane %v6029_v42, %v2696_v47 }
 0x974   : > { %v6056_v4 = vpop.f32.mrf.mxu0  ;;  %v6058_v26 = vpop.f32.mrf.mxu1  ;;  %3815 = vmatpush1.xpose.msra.mxu1 %v2628_v30  ;;  %3741 = vmatprep.subr.mxu0 %v2611_v13  ;;  %v2614_v19 = vunpack.c.l.bf16 %v2576_v21  ;;  %v2616_v30 = vunpack.c.l.bf16 %v2577_v15 }
 0x975   : > { %3816 = vmatprep.subr.mxu1 %v2613_v7  ;;  %v3285_v10 = vadd.f32 %v6056_v4, %v2721_v14  ;;  %v3362_v2 = vadd.f32 %v6058_v26, %v2729_v44 }
 0x976   : > { %v3286_v34 = vpop.f32.mrf.mxu0  ;;  %v3363_v46 = vpop.f32.mrf.mxu1 }
 0x977   : > { %3742 = vmatpush1.xpose.msra.mxu0 %v2610_v0  ;;  %v3287_v32 = vadd.f32 %v3286_v34, %v6064_v37  ;;  %v3364_v50 = vadd.f32 %v3363_v46, %v6071_v45  ;;  %v3384_v47 = vmax.f32 %v3285_v10, 0.0  ;;  %v3386_v59 = vmax.f32 %v3362_v2, 0.0 }
 0x978   : > { %3817 = vmatpush1.xpose.msra.mxu1 %v2612_v18  ;;  %3885 = vmatprep.subr.mxu0 %v2663_v62  ;;  %v3290_v63 = vpop.f32.mrf.mxu0  ;;  %v3367_v8 = vpop.f32.mrf.mxu1 }
 0x979   : > { %3960 = vmatprep.subr.mxu1 %v2665_v27  ;;  %v3385_v55 = vmax.f32 %v3287_v32, 0.0  ;;  %v3387_v57 = vmax.f32 %v3364_v50, 0.0  ;;  %v3291_v42 = vadd.f32 %v3290_v63, %v2721_v14  ;;  %v3368_v7 = vadd.f32 %v3367_v8, %v2729_v44 }
 0x97a   : > { %3776 = vmatmul.mubr.f32.vlgmr.msra.gmra.mxu0 %v3380_v48  ;;  %v3292_v25 = vpop.f32.mrf.mxu0  ;;  %v3369_v17 = vpop.f32.mrf.mxu1 }
 0x97b   : > { %3851 = vmatmul.mubr.f32.vlgmr.msra.gmra.mxu1 %v3382_v61  ;;  %3780 = vmatprep.mubr.f32.mxu0 %v3397_v49  ;;  %v3293_v13 = vadd.f32 %v3292_v25, %v6064_v37  ;;  %v3370_v3 = vadd.f32 %v3369_v17, %v6071_v45  ;;  %v3400_v0 = vmax.f32 %v3291_v42, 0.0  ;;  %v3402_v35 = vmax.f32 %v3368_v7, 0.0 }
 0x97c   : > { %3855 = vmatprep.mubr.f32.mxu1 %v3399_v43  ;;  %3886 = vmatpush1.xpose.msra.mxu0 %v2662_v39 }
 0x97d   : > { %3961 = vmatpush1.xpose.msra.mxu1 %v2664_v20  ;;  %3887 = vmatprep.subr.mxu0 %v2647_v24  ;;  %v3401_v1 = vmax.f32 %v3293_v13, 0.0  ;;  %v3403_v6 = vmax.f32 %v3370_v3, 0.0 }
 0x97e   : > { %3781 = vmatmul.mubr.f32.gmra.mxu0 %v3396_v53  ;;  %3962 = vmatprep.subr.mxu1 %v2649_v51 }
 0x97f   : > { %3856 = vmatmul.mubr.f32.gmra.mxu1 %v3398_v9  ;;  %3925 = vmatprep.mubr.f32.mxu0 %v3385_v55 }
 0x980   : > { %3888 = vmatpush1.xpose.msra.mxu0 %v2646_v5  ;;  %4000 = vmatprep.mubr.f32.mxu1 %v3387_v57 }
 0x981   : > { %3963 = vmatpush1.xpose.msra.mxu1 %v2648_v56  ;;  %3889 = vmatprep.subr.mxu0 %v2631_v60 }
 0x982   : > { %3964 = vmatprep.subr.mxu1 %v2633_v16 }
 0x984   : > { %3890 = vmatpush1.xpose.msra.mxu0 %v2630_v22 }
 0x985   : > { %3965 = vmatpush1.xpose.msra.mxu1 %v2632_v31  ;;  %3891 = vmatprep.subr.mxu0 %v2615_v33 }
 0x986   : > { %3966 = vmatprep.subr.mxu1 %v2617_v36 }
 0x988   : > { %3892 = vmatpush1.xpose.msra.mxu0 %v2614_v19 }
 0x989   : > { %3967 = vmatpush1.xpose.msra.mxu1 %v2616_v30 }
 0x98b   : > { %3926 = vmatmul.mubr.f32.vlgmr.msra.gmra.mxu0 %v3384_v47 }
 0x98c   : > { %4001 = vmatmul.mubr.f32.vlgmr.msra.gmra.mxu1 %v3386_v59  ;;  %3930 = vmatprep.mubr.f32.mxu0 %v3401_v1 }
 0x98d   : > { %4005 = vmatprep.mubr.f32.mxu1 %v3403_v6 }
 0x98f   : > { %3931 = vmatmul.mubr.f32.gmra.mxu0 %v3400_v0 }
 0x990   : > { %4006 = vmatmul.mubr.f32.gmra.mxu1 %v3402_v35 }
 0xa19   : > { %v3477_v4 = vpop.f32.mrf.mxu0  ;;  %v3552_v26 = vpop.f32.mrf.mxu1 }
 0xa1a   : > { %v3478_v20 = vadd.f32 %v4396_v40, %v3477_v4 }
 0xa1b   : > { %v3479_v18 = vpop.f32.mrf.mxu0  ;;  %v3554_v62 = vpop.f32.mrf.mxu1 }
 0xa1c   : > { %v3553_v32 = vadd.f32 %v3552_v26, %v3478_v20 }
 0xa21   : > { %v3482_v29 = vpop.f32.mrf.mxu0  ;;  %v3557_v38 = vpop.f32.mrf.mxu1 }
 0xa22   : > { %v3483_v43 = vadd.f32 %v4396_v40, %v3482_v29 }
 0xa23   : > { %v3484_v37 = vpop.f32.mrf.mxu0  ;;  %v3559_v27 = vpop.f32.mrf.mxu1 }
 0xa24   : > { %v3558_v5 = vadd.f32 %v3557_v38, %v3483_v43 }
 0xa29   : > { %v3627_v11 = vpop.f32.mrf.mxu0  ;;  %v3702_v12 = vpop.f32.mrf.mxu1 }
 0xa2a   : > { %v3628_v23 = vadd.f32 %v3627_v11, %v3553_v32 }
 0xa2b   : > { %v3629_v34 = vpop.f32.mrf.mxu0  ;;  %v3704_v45 = vpop.f32.mrf.mxu1 }
 0xa2c   : > { %v3703_v9 = vadd.f32 %v3702_v12, %v3628_v23  ;;  %v4397_v45 = vld [vmem:[%s976_s13] ss:$0 sm:$0xff]  ;;  %s4869_s13 = scalar_lea.vmem %s4074_s25, 256 }
 0xa2d   : > { %v3632_v46 = vpop.f32.mrf.mxu0  ;;  %v3707_v39 = vpop.f32.mrf.mxu1  ;;  %p4870_p4 = scmp.ne.s32.totalorder %s4074_s25, %s4869_s13  ;;  %p4877_p0 = scmp.lt.s32.totalorder %s4869_s13, %s4869_s13 }
 0xa2e   : > { %v3633_v55 = vadd.f32 %v3632_v46, %v3558_v5 }
 0xa2f   : > { %v3634_v28 = vpop.f32.mrf.mxu0  ;;  %v3709_v48 = vpop.f32.mrf.mxu1  ;;  %p4871_p6 = pnand %p4870_p4, %p4695_p1  ;;  %p4878_p9 = por %p4877_p0, %p4876_p12 }
 0xa30   : > { %v3708_v60 = vadd.f32 %v3707_v39, %v3633_v55  ;;  %v4398_v39 = vld [vmem:[%s979_s15] ss:$0 sm:$0xff] }
 0xa31   : > { %p4872_p10 = pneg %p4871_p6 }
 0xa33   : > { %p4879_p13 = pnand %p4878_p9, %p4872_p10 }
 0xa3a   : > { %v3777_v24 = vpop.f32.mrf.mxu0 }
 0xa3b   : > { %v3852_v61 = vpop.f32.mrf.mxu1  ;;  %v3778_v56 = vadd.f32 %v3777_v24, %v3703_v9 }
 0xa3c   : > { %v3779_v41 = vpop.f32.mrf.mxu0 }
 0xa3d   : > { %v3854_v49 = vpop.f32.mrf.mxu1  ;;  %v3853_v57 = vadd.f32 %v3852_v61, %v3778_v56 }
 0xa3e   : > { %v3782_v50 = vpop.f32.mrf.mxu0 }
 0xa3f   : > { %v3857_v51 = vpop.f32.mrf.mxu1  ;;  %v3783_v16 = vadd.f32 %v3782_v50, %v3708_v60 }
 0xa40   : > { %v3784_v52 = vpop.f32.mrf.mxu0 }
 0xa41   : > { %v3859_v53 = vpop.f32.mrf.mxu1  ;;  %v3858_v22 = vadd.f32 %v3857_v51, %v3783_v16 }
 0xa4b   : > { %v3927_v21 = vpop.f32.mrf.mxu0 }
 0xa4c   : > { %v3928_v63 = vadd.f32 %v3927_v21, %v3853_v57  ;;  %v4002_v15 = vpop.f32.mrf.mxu1 }
 0xa4d   : > { %v3929_v8 = vpop.f32.mrf.mxu0 }
 0xa4e   : > { %v4003_v14 = vadd.f32 %v4002_v15, %v3928_v63  ;;  %v4004_v31 = vpop.f32.mrf.mxu1 }
 0xa4f   : > { %v3932_v33 = vpop.f32.mrf.mxu0 }
 0xa50   : > { %v4011_v44 = vadd.f32 %v4003_v14, %v5916_v58  ;;  %v3933_v36 = vadd.f32 %v3932_v33, %v3858_v22  ;;  %v4007_v25 = vpop.f32.mrf.mxu1 }
 0xa51   : > { %v3934_v17 = vpop.f32.mrf.mxu0 }
 0xa52   : > { %v4008_v19 = vadd.f32 %v4007_v25, %v3933_v36  ;;  %v4009_v10 = vpop.f32.mrf.mxu1  ;;  %v4015_v30 = vsel %vm1174_vm4, %v4011_v44, 0.0  ;;  %v4023_v2 = vmul.f32 %v4011_v44, %v4011_v44 }
 0xa53   : > { %4016 = vadd.xlane.f32.xlu1 %v4015_v30 }
 0xa54   : > { %v4012_v13 = vadd.f32 %v4008_v19, %v5931_v54  ;;  %v4025_v3 = vsel %vm1174_vm4, %v4023_v2, 0.0 }
 0xa56   : > { %v4018_v47 = vsel %vm1174_vm4, %v4012_v13, 0.0  ;;  %v4024_v42 = vmul.f32 %v4012_v13, %v4012_v13 }
 0xa57   : > { %4026 = vadd.xlane.f32.xlu1 %v4025_v3 }
 0xa58   : > { %v4028_v58 = vsel %vm1174_vm4, %v4024_v42, 0.0 }
 0xa5b   : > { %4019 = vadd.xlane.f32.xlu1 %v4018_v47 }
 0xa5f   : > { %4029 = vadd.xlane.f32.xlu1 %v4028_v58 }
 0xadc   : > { %v4017_v59 = vpop.xlane.xlu1 %4016 }
 0xadd   : > { %v4021_v7 = vmul.f32 0.03125, %v4017_v59 }
 0xadf   : > { %v4033_v6 = vmul.f32 %v4021_v7, %v4021_v7  ;;  %v4039_v12 = vsub.f32 %v4011_v44, %v4021_v7 }
 0xae0   : > { %v4027_v1 = vpop.xlane.xlu1 %4026 }
 0xae1   : > { %v4031_v0 = vmul.f32 0.03125, %v4027_v1 }
 0xae3   : > { %v4035_v35 = vsub.f32 %v4031_v0, %v4033_v6 }
 0xae4   : > { %v4020_v4 = vpop.xlane.xlu1 %4019 }
 0xae5   : > { %v4037_v54 = vmax.f32 %v4035_v35, 0.0  ;;  %v4022_v26 = vmul.f32 0.03125, %v4020_v4 }
 0xae7   : > { %v4041_v18 = vadd.f32 1e-05, %v4037_v54  ;;  %v4034_v29 = vmul.f32 %v4022_v26, %v4022_v26  ;;  %v4040_v40 = vsub.f32 %v4012_v13, %v4022_v26 }
 0xae8   : > { %v4030_v62 = vpop.xlane.xlu1 %4029 }
 0xae9   : > { %4807 = vrsqrt.f32 %v4041_v18  ;;  %v4032_v38 = vmul.f32 0.03125, %v4030_v62 }
 0xaeb   : > { %v4036_v37 = vsub.f32 %v4032_v38, %v4034_v29 }
 0xaed   : > { %v4038_v27 = vmax.f32 %v4036_v37, 0.0 }
 0xaef   : > { %v4042_v11 = vadd.f32 1e-05, %v4038_v27 }
 0xaf1   : > { %4809 = vrsqrt.f32 %v4042_v11 }
 0xaf6   : > { %v4808_v34 = vpop.eup %4807 }
 0xaf7   : > { %v4045_v46 = vmul.f32 %v4808_v34, %v4039_v12 }
 0xaf9   : > { %v4053_v28 = vmul.f32 %v4397_v45, %v4045_v46 }
 0xafb   : > { %v4061_v48 = vadd.f32 %v4398_v39, %v4053_v28 }
 0xafd   : > { %4063 = vst.msk [vmem:[#allocation2] sm:$0xff] %vm1174_vm4, %v4061_v48  ;;  %4065 = vst.msk [vmem:[#allocation8] sm:$0xff] %vm1174_vm4, %v4061_v48 }
 0xafe   : > { %v4810_v20 = vpop.eup %4809 }
 0xaff   : > { %v4046_v24 = vmul.f32 %v4810_v20, %v4040_v40 }
 0xb01   : > { %v4054_v61 = vmul.f32 %v4397_v45, %v4046_v24 }
 0xb03   : > { %v4062_v41 = vadd.f32 %v4398_v39, %v4054_v61 }
 0xb05   : > { %4064 = vst.msk [vmem:[#allocation2 + $0x8] sm:$0xff] %vm1174_vm4, %v4062_v41  ;;  %4066 = vst.msk [vmem:[#allocation8 + $0x8] sm:$0xff] %vm1174_vm4, %v4062_v41 }
 0xb06   : > { %4882 = shalt.err (!%p4879_p13)
}
 0xb07   : > { %s4946_s15 = smov 128   ;;  %s4947_s21 = smov 8  }
 0xb08   : > { %s6244_s2 = sld [smem:[#allocation35_spill]] }
 0xb0e   : > { %4684 = dma.vmem_to_hbm [thread:$0]  (%p4695_p1), %s4074_s25, 256, %s6244_s2, [#allocation5], %s4946_s15, %s4946_s15, %s4947_s21  }
 0xb0f   : > { %4918 = dma.done.wait (%p4695_p1), [#allocation5], 256  }
 0xb10   : > { %4920 = vsyncadd (%p4695_p1), [#allocation5], 4294967040 }
 0xb11 PF: > { %s6245_s25 = sld [smem:[#allocation14_spill]] }
 0xb12   : > { %s6246_s4 = sld [smem:[#allocation12_spill]] }
 0xb13   : > { %s6247_s30 = sld [smem:[#allocation13_spill]] }
 0xb14   : > { %s6248_s24 = sld [smem:[#allocation15_spill]] }
 0xb17   : > { %p37_p2 = scmp.ge.s32.totalorder %s6245_s25, 4  }
 0xb19   :  { %39 = sbr.rel (!%p37_p2) target bundleno = 25 (0x19), region = 208 }
 0xb1e   :  { %4089 = vsyncpa [#allocation4], 1 }
 0xb1f   :  { %4091 = vsyncpa [#allocation4 + $0x1], 1 }
 0xb20   :  { %4092 = vsyncpa [#allocation7], 1 }
 0xb21   :  { %4094 = vsyncpa [#allocation7 + $0x1], 1 }
 0xb22   :  { %4095 = vsyncpa [#allocation5], 1 }
 0xb23   :  { %4097 = vsyncpa [#allocation5 + $0x1], 1 }

</bundles_post_ra>
